<compile_context>
chip_gen: v5e
topology: v5e:2x2
jax: 0.10.0
libtpu: 0.0.40
codegen_flags: <defaults>
</compile_context>

<pallas_src>
import jax
import jax.numpy as jnp
from jax.experimental import pallas as pl
from jax.experimental.pallas import tpu as pltpu

# ---- model dimensions (small, deterministic synthetic config) ----
BATCH    = 2
SEQ      = 8
D_MODEL  = 32
N_HEADS  = 4
D_HEAD   = D_MODEL // N_HEADS
D_FF     = 64
N_LAYERS = 2
EPS      = 1e-5
ROWS     = BATCH * SEQ          # batch folded into rows
BH       = BATCH * N_HEADS      # folded attention batch (batch x heads)


def _layer_norm(x, g, b):
    mu  = jnp.mean(x, axis=-1, keepdims=True)
    var = jnp.mean((x - mu) ** 2, axis=-1, keepdims=True)
    return (x - mu) * jax.lax.rsqrt(var + EPS) * g + b


# --------------------- fused Encoder kernel (grid = layers) -------------------
def encoder_kernel(x_ref, wqkv_ref, wo_ref, w1_ref, w2_ref,
                   bqkv_ref, vecd_ref, b1_ref, fnorm_ref,
                   y_ref, attn_ref, xs_ref):
    l = pl.program_id(0)

    # layer 0: seed the carried activation from the kernel input
    @pl.when(l == 0)
    def _():
        xs_ref[...] = x_ref[...]

    x = xs_ref[...]                                        # [B*L, D] f32

    vecs = vecd_ref[0]                                     # [6, D] packed vectors
    bo, ln1_g, ln1_b = vecs[0:1], vecs[1:2], vecs[2:3]
    b2, ln2_g, ln2_b = vecs[3:4], vecs[4:5], vecs[5:6]

    # --- fused QKV projection: one [B*L, D] @ [D, 3D] bf16 matmul ---
    # (1/sqrt(D_HEAD) is pre-folded into the Q columns / bias at init)
    qkv = jnp.dot(x.astype(jnp.bfloat16), wqkv_ref[0],
                  preferred_element_type=jnp.float32) + bqkv_ref[0]    # [B*L, 3D] f32

    def split_heads(base):
        # [B*L, D] columns -> [B*H, L, Dh] (head regroup via slice+concat;
        # leading-dim-only reshapes, minor dim untouched)
        hs = [qkv[:, base + h * D_HEAD: base + (h + 1) * D_HEAD]
              .reshape(BATCH, 1, SEQ, D_HEAD) for h in range(N_HEADS)]
        return jnp.concatenate(hs, axis=1).reshape(BH, SEQ, D_HEAD)

    q = split_heads(0 * D_MODEL)
    k = split_heads(1 * D_MODEL)
    v = split_heads(2 * D_MODEL)

    # --- FullAttention, one batched einsum pair over (B*H) ---
    s = jnp.einsum('bld,bmd->blm',
                   q.astype(jnp.bfloat16), k.astype(jnp.bfloat16),
                   preferred_element_type=jnp.float32)                 # [B*H, L, L]
    s = s - jnp.max(s, axis=-1, keepdims=True)
    e = jnp.exp(s)
    p = e / jnp.sum(e, axis=-1, keepdims=True)        # exact softmax (rows sum to 1)

    # single per-layer store; (B*H, L, L) flattened order == [B, H, L, L]
    attn_ref[0] = p

    ctx = jnp.einsum('blm,bmd->bld',
                     p.astype(jnp.bfloat16), v.astype(jnp.bfloat16),
                     preferred_element_type=jnp.float32)               # [B*H, L, Dh]
    ctx4 = ctx.reshape(BATCH, N_HEADS, SEQ, D_HEAD)
    ctx_all = jnp.concatenate(
        [ctx4[:, h:h + 1, :, :].reshape(ROWS, D_HEAD) for h in range(N_HEADS)],
        axis=-1)                                                       # [B*L, D]

    attn_out = jnp.dot(ctx_all.astype(jnp.bfloat16), wo_ref[0],
                       preferred_element_type=jnp.float32) + bo

    # residual + norm1 (dropout = identity in eval)
    x1 = _layer_norm(x + attn_out, ln1_g, ln1_b)

    # --- position-wise FFN: Conv1d(k=1) -> ReLU -> Conv1d(k=1), bf16 MXU ---
    yff = jnp.dot(x1.astype(jnp.bfloat16), w1_ref[0],
                  preferred_element_type=jnp.float32) + b1_ref[0]
    yff = jnp.maximum(yff, 0.0)
    yff = jnp.dot(yff.astype(jnp.bfloat16), w2_ref[0],
                  preferred_element_type=jnp.float32) + b2

    # residual + norm2 -> carried activation for the next layer
    x_out = _layer_norm(x1 + yff, ln2_g, ln2_b)
    xs_ref[...] = x_out

    # final encoder LayerNorm, written once at the last layer (resident output)
    @pl.when(l == pl.num_programs(0) - 1)
    def _():
        y_ref[...] = _layer_norm(x_out, fnorm_ref[0:1], fnorm_ref[1:2])


# ------------------------------ Encoder forward -------------------------------
def encoder_forward(x, params):
    """Mirrors Encoder.forward with conv_layers=None.
    x: [B, L, D] -> (out [B, L, D], [attn_l of shape [B, H, L, L]] * N_LAYERS)."""
    x2d = x.reshape(ROWS, D_MODEL)

    def per_layer(shape):   # block l of a per-layer stacked slab
        return pl.BlockSpec(shape, lambda l: (l,) + (0,) * (len(shape) - 1))

    def const(shape):       # same block every layer (stays VMEM-resident)
        return pl.BlockSpec(shape, lambda l: (0,) * len(shape))

    in_specs = [
        const((ROWS, D_MODEL)),                          # x (batch folded into rows)
        per_layer((1, D_MODEL, 3 * D_MODEL)),            # Wqkv  (bf16, scale folded)
        per_layer((1, D_MODEL, D_MODEL)),                # Wo    (bf16)
        per_layer((1, D_MODEL, D_FF)),                   # W1    (bf16)
        per_layer((1, D_FF, D_MODEL)),                   # W2    (bf16)
        per_layer((1, 1, 3 * D_MODEL)),                  # fused QKV bias
        per_layer((1, 6, D_MODEL)),                      # packed D-wide bias/LN vectors
        per_layer((1, 1, D_FF)),                         # b1
        const((2, D_MODEL)),                             # final LayerNorm gamma/beta
    ]
    out_specs = (
        const((ROWS, D_MODEL)),                          # y (written at last layer)
        per_layer((1, BH, SEQ, SEQ)),                    # attention maps, one block/layer
    )
    out_shape = (
        jax.ShapeDtypeStruct((ROWS, D_MODEL), jnp.float32),
        jax.ShapeDtypeStruct((N_LAYERS, BH, SEQ, SEQ), jnp.float32),
    )

    y2d, attn = pl.pallas_call(
        encoder_kernel,
        grid=(N_LAYERS,),
        in_specs=in_specs,
        out_specs=out_specs,
        out_shape=out_shape,
        scratch_shapes=[pltpu.VMEM((ROWS, D_MODEL), jnp.float32)],   # carried activation
        compiler_params=pltpu.CompilerParams(
            dimension_semantics=("arbitrary",)),        # layers are sequential
    )(x2d, params["wqkv"], params["wo"], params["w1"], params["w2"],
      params["bqkv"], params["vec_d"], params["b1"], params["fnorm"])

    attn5 = attn.reshape(N_LAYERS, BATCH, N_HEADS, SEQ, SEQ)   # wrapper-side reshape
    return y2d.reshape(BATCH, SEQ, D_MODEL), [attn5[i] for i in range(N_LAYERS)]

# TODO(synk): conv_layers (ConvLayer: circular Conv1d k=3 + BatchNorm1d + ELU +
# MaxPool1d) path of Encoder.forward is not instantiated in this config.


# ------------------------------ param init ------------------------------------
def init_params(key):
    def dense(k, fan_in, shape):
        return jax.random.normal(k, shape, jnp.float32) / jnp.sqrt(fan_in)

    scale = 1.0 / float(jnp.sqrt(jnp.float32(D_HEAD)))
    wqkv, wo, w1, w2, bqkv, vec_d, b1 = [], [], [], [], [], [], []
    for _ in range(N_LAYERS):
        key, k_q, k_k, k_v, k_o, k_1, k_2 = jax.random.split(key, 7)
        wq = dense(k_q, D_MODEL, (D_MODEL, D_MODEL)) * scale   # fold 1/sqrt(Dh) into Q
        wk = dense(k_k, D_MODEL, (D_MODEL, D_MODEL))
        wv = dense(k_v, D_MODEL, (D_MODEL, D_MODEL))
        wqkv.append(jnp.concatenate([wq, wk, wv], axis=-1).astype(jnp.bfloat16))
        wo.append(dense(k_o, D_MODEL, (D_MODEL, D_MODEL)).astype(jnp.bfloat16))
        w1.append(dense(k_1, D_MODEL, (D_MODEL, D_FF)).astype(jnp.bfloat16))
        w2.append(dense(k_2, D_FF, (D_FF, D_MODEL)).astype(jnp.bfloat16))
        # fused QKV bias [bq*scale | bk | bv] (zeros in this init, kept for generality)
        bqkv.append(jnp.zeros((1, 3 * D_MODEL), jnp.float32))
        zero = jnp.zeros((D_MODEL,), jnp.float32)
        one  = jnp.ones((D_MODEL,), jnp.float32)
        # packed rows: bo, ln1_g, ln1_b, b2, ln2_g, ln2_b
        vec_d.append(jnp.stack([zero, one, zero, zero, one, zero]))
        b1.append(jnp.zeros((1, D_FF), jnp.float32))

    return dict(
        wqkv=jnp.stack(wqkv), wo=jnp.stack(wo), w1=jnp.stack(w1), w2=jnp.stack(w2),
        bqkv=jnp.stack(bqkv), vec_d=jnp.stack(vec_d), b1=jnp.stack(b1),
        fnorm=jnp.stack([jnp.ones((D_MODEL,), jnp.float32),
                         jnp.zeros((D_MODEL,), jnp.float32)]),
    )


if __name__ == "__main__":
    key = jax.random.PRNGKey(0)
    key, xk = jax.random.split(key)
    x = jax.random.normal(xk, (BATCH, SEQ, D_MODEL), jnp.float32)

    params = init_params(key)

    out, attns = encoder_forward(x, params)
    out = jax.block_until_ready(out)
    for a in attns:
        jax.block_until_ready(a)

    assert out.shape == (BATCH, SEQ, D_MODEL)
    assert len(attns) == N_LAYERS
    assert attns[0].shape == (BATCH, N_HEADS, SEQ, SEQ)
    assert bool(jnp.all(jnp.isfinite(out)))
    # exact softmax: every attention row sums to 1
    assert bool(jnp.allclose(jnp.sum(attns[0], axis=-1), 1.0, atol=1e-4))
    print("KERNEL_OK")
</pallas_src>

<mosaic_0001>
module attributes {stable_mosaic.version = 11 : i64} {
  func.func @encoder_kernel(%arg0: i32, %arg1: memref<16x32xf32, #tpu.memory_space<vmem>>, %arg2: memref<1x32x96xbf16, #tpu.memory_space<vmem>>, %arg3: memref<1x32x32xbf16, #tpu.memory_space<vmem>>, %arg4: memref<1x32x64xbf16, #tpu.memory_space<vmem>>, %arg5: memref<1x64x32xbf16, #tpu.memory_space<vmem>>, %arg6: memref<1x1x96xf32, #tpu.memory_space<vmem>>, %arg7: memref<1x6x32xf32, #tpu.memory_space<vmem>>, %arg8: memref<1x1x64xf32, #tpu.memory_space<vmem>>, %arg9: memref<2x32xf32, #tpu.memory_space<vmem>>, %arg10: memref<16x32xf32, #tpu.memory_space<vmem>>, %arg11: memref<1x8x8x8xf32, #tpu.memory_space<vmem>>, %arg12: memref<16x32xf32, #tpu.memory_space<vmem>>) attributes {dimension_semantics = [#tpu.dimension_semantics<arbitrary>], iteration_bounds = array<i64: 2>, scalar_prefetch = 0 : i64, scratch_operands = 1 : i64, tpu.core_type = #tpu.core_type<tc>, window_params = [{pipeline_mode = #tpu.pipeline_mode<synchronous>, transform_indices = @transform_0, window_bounds = array<i64: 16, 32>}, {transform_indices = @transform_1, window_bounds = array<i64: 1, 32, 96>}, {transform_indices = @transform_2, window_bounds = array<i64: 1, 32, 32>}, {transform_indices = @transform_3, window_bounds = array<i64: 1, 32, 64>}, {transform_indices = @transform_4, window_bounds = array<i64: 1, 64, 32>}, {transform_indices = @transform_5, window_bounds = array<i64: 1, 1, 96>}, {transform_indices = @transform_6, window_bounds = array<i64: 1, 6, 32>}, {transform_indices = @transform_7, window_bounds = array<i64: 1, 1, 64>}, {pipeline_mode = #tpu.pipeline_mode<synchronous>, transform_indices = @transform_8, window_bounds = array<i64: 2, 32>}, {pipeline_mode = #tpu.pipeline_mode<synchronous>, transform_indices = @transform_9, window_bounds = array<i64: 16, 32>}, {transform_indices = @transform_10, window_bounds = array<i64: 1, 8, 8, 8>}]} {
    %c0_i32 = arith.constant 0 : i32
    %0 = arith.cmpi eq, %arg0, %c0_i32 : i32
    %1 = arith.extui %0 : i1 to i32
    %c0_i32_0 = arith.constant 0 : i32
    %2 = arith.cmpi ne, %1, %c0_i32_0 : i32
    scf.if %2 {
      %c0_48 = arith.constant 0 : index
      %c0_49 = arith.constant 0 : index
      %150 = vector.load %arg1[%c0_48, %c0_49] : memref<16x32xf32, #tpu.memory_space<vmem>>, vector<16x32xf32>
      %c0_50 = arith.constant 0 : index
      %c0_51 = arith.constant 0 : index
      %151 = vector.load %arg12[%c0_50, %c0_51] : memref<16x32xf32, #tpu.memory_space<vmem>>, vector<16x32xf32>
      tpu.vector_store %arg12[%c0_50, %c0_51], %150 {strides = array<i32>} : memref<16x32xf32, #tpu.memory_space<vmem>>, vector<16x32xf32>,
    } else {
    }
    %c0 = arith.constant 0 : index
    %c0_1 = arith.constant 0 : index
    %3 = vector.load %arg12[%c0, %c0_1] : memref<16x32xf32, #tpu.memory_space<vmem>>, vector<16x32xf32>
    %c0_2 = arith.constant 0 : index
    %c0_3 = arith.constant 0 : index
    %c0_4 = arith.constant 0 : index
    %4 = vector.load %arg7[%c0_2, %c0_3, %c0_4] : memref<1x6x32xf32, #tpu.memory_space<vmem>>, vector<1x6x32xf32>
    %5 = vector.shape_cast %4 : vector<1x6x32xf32> to vector<6x32xf32>
    %6 = vector.extract_strided_slice %5 {offsets = [0, 0], sizes = [1, 32], strides = [1, 1]} : vector<6x32xf32> to vector<1x32xf32>
    %7 = vector.extract_strided_slice %5 {offsets = [1, 0], sizes = [1, 32], strides = [1, 1]} : vector<6x32xf32> to vector<1x32xf32>
    %8 = vector.extract_strided_slice %5 {offsets = [2, 0], sizes = [1, 32], strides = [1, 1]} : vector<6x32xf32> to vector<1x32xf32>
    %9 = vector.extract_strided_slice %5 {offsets = [3, 0], sizes = [1, 32], strides = [1, 1]} : vector<6x32xf32> to vector<1x32xf32>
    %10 = vector.extract_strided_slice %5 {offsets = [4, 0], sizes = [1, 32], strides = [1, 1]} : vector<6x32xf32> to vector<1x32xf32>
    %11 = vector.extract_strided_slice %5 {offsets = [5, 0], sizes = [1, 32], strides = [1, 1]} : vector<6x32xf32> to vector<1x32xf32>
    %12 = arith.truncf %3 : vector<16x32xf32> to vector<16x32xbf16>
    %c0_5 = arith.constant 0 : index
    %c0_6 = arith.constant 0 : index
    %c0_7 = arith.constant 0 : index
    %13 = vector.load %arg2[%c0_5, %c0_6, %c0_7] : memref<1x32x96xbf16, #tpu.memory_space<vmem>>, vector<1x32x96xbf16>
    %14 = vector.shape_cast %13 : vector<1x32x96xbf16> to vector<32x96xbf16>
    %cst = arith.constant dense<0.000000e+00> : vector<16x96xf32>
    %15 = tpu.matmul %12, %14, %cst {dimension_numbers = #tpu.dot_dimension_numbers<[1], [0], [0], [1], [0, 0, 1, 1], [], []>} : vector<16x32xbf16>, vector<32x96xbf16>, vector<16x96xf32> -> vector<16x96xf32>
    %c0_8 = arith.constant 0 : index
    %c0_9 = arith.constant 0 : index
    %c0_10 = arith.constant 0 : index
    %16 = vector.load %arg6[%c0_8, %c0_9, %c0_10] : memref<1x1x96xf32, #tpu.memory_space<vmem>>, vector<1x1x96xf32>
    %17 = vector.shape_cast %16 : vector<1x1x96xf32> to vector<1x96xf32>
    %18 = vector.broadcast %17 : vector<1x96xf32> to vector<16x96xf32>
    %19 = arith.addf %15, %18 : vector<16x96xf32>
    %20 = vector.extract_strided_slice %19 {offsets = [0, 0], sizes = [16, 8], strides = [1, 1]} : vector<16x96xf32> to vector<16x8xf32>
    %21 = vector.shape_cast %20 : vector<16x8xf32> to vector<2x1x8x8xf32>
    %22 = vector.extract_strided_slice %19 {offsets = [0, 8], sizes = [16, 8], strides = [1, 1]} : vector<16x96xf32> to vector<16x8xf32>
    %23 = vector.shape_cast %22 : vector<16x8xf32> to vector<2x1x8x8xf32>
    %24 = vector.extract_strided_slice %19 {offsets = [0, 16], sizes = [16, 8], strides = [1, 1]} : vector<16x96xf32> to vector<16x8xf32>
    %25 = vector.shape_cast %24 : vector<16x8xf32> to vector<2x1x8x8xf32>
    %26 = vector.extract_strided_slice %19 {offsets = [0, 24], sizes = [16, 8], strides = [1, 1]} : vector<16x96xf32> to vector<16x8xf32>
    %27 = vector.shape_cast %26 : vector<16x8xf32> to vector<2x1x8x8xf32>
    %28 = tpu.concatenate %21, %23, %25, %27 in 1 : vector<2x1x8x8xf32>, vector<2x1x8x8xf32>, vector<2x1x8x8xf32>, vector<2x1x8x8xf32> -> vector<2x4x8x8xf32>
    %29 = vector.shape_cast %28 : vector<2x4x8x8xf32> to vector<8x8x8xf32>
    %30 = vector.extract_strided_slice %19 {offsets = [0, 32], sizes = [16, 8], strides = [1, 1]} : vector<16x96xf32> to vector<16x8xf32>
    %31 = vector.shape_cast %30 : vector<16x8xf32> to vector<2x1x8x8xf32>
    %32 = vector.extract_strided_slice %19 {offsets = [0, 40], sizes = [16, 8], strides = [1, 1]} : vector<16x96xf32> to vector<16x8xf32>
    %33 = vector.shape_cast %32 : vector<16x8xf32> to vector<2x1x8x8xf32>
    %34 = vector.extract_strided_slice %19 {offsets = [0, 48], sizes = [16, 8], strides = [1, 1]} : vector<16x96xf32> to vector<16x8xf32>
    %35 = vector.shape_cast %34 : vector<16x8xf32> to vector<2x1x8x8xf32>
    %36 = vector.extract_strided_slice %19 {offsets = [0, 56], sizes = [16, 8], strides = [1, 1]} : vector<16x96xf32> to vector<16x8xf32>
    %37 = vector.shape_cast %36 : vector<16x8xf32> to vector<2x1x8x8xf32>
    %38 = tpu.concatenate %31, %33, %35, %37 in 1 : vector<2x1x8x8xf32>, vector<2x1x8x8xf32>, vector<2x1x8x8xf32>, vector<2x1x8x8xf32> -> vector<2x4x8x8xf32>
    %39 = vector.shape_cast %38 : vector<2x4x8x8xf32> to vector<8x8x8xf32>
    %40 = vector.extract_strided_slice %19 {offsets = [0, 64], sizes = [16, 8], strides = [1, 1]} : vector<16x96xf32> to vector<16x8xf32>
    %41 = vector.shape_cast %40 : vector<16x8xf32> to vector<2x1x8x8xf32>
    %42 = vector.extract_strided_slice %19 {offsets = [0, 72], sizes = [16, 8], strides = [1, 1]} : vector<16x96xf32> to vector<16x8xf32>
    %43 = vector.shape_cast %42 : vector<16x8xf32> to vector<2x1x8x8xf32>
    %44 = vector.extract_strided_slice %19 {offsets = [0, 80], sizes = [16, 8], strides = [1, 1]} : vector<16x96xf32> to vector<16x8xf32>
    %45 = vector.shape_cast %44 : vector<16x8xf32> to vector<2x1x8x8xf32>
    %46 = vector.extract_strided_slice %19 {offsets = [0, 88], sizes = [16, 8], strides = [1, 1]} : vector<16x96xf32> to vector<16x8xf32>
    %47 = vector.shape_cast %46 : vector<16x8xf32> to vector<2x1x8x8xf32>
    %48 = tpu.concatenate %41, %43, %45, %47 in 1 : vector<2x1x8x8xf32>, vector<2x1x8x8xf32>, vector<2x1x8x8xf32>, vector<2x1x8x8xf32> -> vector<2x4x8x8xf32>
    %49 = vector.shape_cast %48 : vector<2x4x8x8xf32> to vector<8x8x8xf32>
    %50 = arith.truncf %29 : vector<8x8x8xf32> to vector<8x8x8xbf16>
    %51 = arith.truncf %39 : vector<8x8x8xf32> to vector<8x8x8xbf16>
    "tpu.trace_start"() <{level = 10 : i32, message = "bld,bmd->blm"}> : () -> ()
    %cst_11 = arith.constant dense<0.000000e+00> : vector<8x8x8xf32>
    %52 = tpu.matmul %50, %51, %cst_11 {dimension_numbers = #tpu.dot_dimension_numbers<[2], [2], [1], [1], [0, 0, 0, 1, 1, 1], [0], [0]>} : vector<8x8x8xbf16>, vector<8x8x8xbf16>, vector<8x8x8xf32> -> vector<8x8x8xf32>
    "tpu.trace_stop"() : () -> ()
    %cst_12 = arith.constant dense<0xFF800000> : vector<8x8xf32>
    %53 = vector.multi_reduction <maximumf>, %52, %cst_12 [2] : vector<8x8x8xf32> to vector<8x8xf32>
    %54 = vector.shape_cast %53 : vector<8x8xf32> to vector<8x8x1xf32>
    %55 = vector.broadcast %54 : vector<8x8x1xf32> to vector<8x8x8xf32>
    %56 = arith.subf %52, %55 : vector<8x8x8xf32>
    %57 = math.exp %56 : vector<8x8x8xf32>
    %cst_13 = arith.constant dense<0.000000e+00> : vector<8x8xf32>
    %58 = vector.multi_reduction <add>, %57, %cst_13 [2] : vector<8x8x8xf32> to vector<8x8xf32>
    %59 = vector.shape_cast %58 : vector<8x8xf32> to vector<8x8x1xf32>
    %60 = vector.broadcast %59 : vector<8x8x1xf32> to vector<8x8x8xf32>
    %61 = arith.divf %57, %60 : vector<8x8x8xf32>
    %c0_14 = arith.constant 0 : index
    %c0_15 = arith.constant 0 : index
    %c0_16 = arith.constant 0 : index
    %c0_17 = arith.constant 0 : index
    %62 = vector.load %arg11[%c0_14, %c0_15, %c0_16, %c0_17] : memref<1x8x8x8xf32, #tpu.memory_space<vmem>>, vector<1x8x8x8xf32>
    %63 = vector.shape_cast %62 : vector<1x8x8x8xf32> to vector<8x8x8xf32>
    %64 = vector.shape_cast %61 : vector<8x8x8xf32> to vector<1x8x8x8xf32>
    tpu.vector_store %arg11[%c0_14, %c0_15, %c0_16, %c0_17], %64 {strides = array<i32>} : memref<1x8x8x8xf32, #tpu.memory_space<vmem>>, vector<1x8x8x8xf32>,
    %65 = arith.truncf %61 : vector<8x8x8xf32> to vector<8x8x8xbf16>
    %66 = arith.truncf %49 : vector<8x8x8xf32> to vector<8x8x8xbf16>
    "tpu.trace_start"() <{level = 10 : i32, message = "blm,bmd->bld"}> : () -> ()
    %cst_18 = arith.constant dense<0.000000e+00> : vector<8x8x8xf32>
    %67 = tpu.matmul %65, %66, %cst_18 {dimension_numbers = #tpu.dot_dimension_numbers<[2], [1], [1], [2], [0, 0, 0, 1, 1, 2], [0], [0]>} : vector<8x8x8xbf16>, vector<8x8x8xbf16>, vector<8x8x8xf32> -> vector<8x8x8xf32>
    "tpu.trace_stop"() : () -> ()
    %68 = vector.shape_cast %67 : vector<8x8x8xf32> to vector<2x4x8x8xf32>
    %69 = vector.extract_strided_slice %68 {offsets = [0, 0, 0, 0], sizes = [2, 1, 8, 8], strides = [1, 1, 1, 1]} : vector<2x4x8x8xf32> to vector<2x1x8x8xf32>
    %70 = vector.shape_cast %69 : vector<2x1x8x8xf32> to vector<16x8xf32>
    %71 = vector.extract_strided_slice %68 {offsets = [0, 1, 0, 0], sizes = [2, 1, 8, 8], strides = [1, 1, 1, 1]} : vector<2x4x8x8xf32> to vector<2x1x8x8xf32>
    %72 = vector.shape_cast %71 : vector<2x1x8x8xf32> to vector<16x8xf32>
    %73 = vector.extract_strided_slice %68 {offsets = [0, 2, 0, 0], sizes = [2, 1, 8, 8], strides = [1, 1, 1, 1]} : vector<2x4x8x8xf32> to vector<2x1x8x8xf32>
    %74 = vector.shape_cast %73 : vector<2x1x8x8xf32> to vector<16x8xf32>
    %75 = vector.extract_strided_slice %68 {offsets = [0, 3, 0, 0], sizes = [2, 1, 8, 8], strides = [1, 1, 1, 1]} : vector<2x4x8x8xf32> to vector<2x1x8x8xf32>
    %76 = vector.shape_cast %75 : vector<2x1x8x8xf32> to vector<16x8xf32>
    %77 = tpu.concatenate %70, %72, %74, %76 in 1 : vector<16x8xf32>, vector<16x8xf32>, vector<16x8xf32>, vector<16x8xf32> -> vector<16x32xf32>
    %78 = arith.truncf %77 : vector<16x32xf32> to vector<16x32xbf16>
    %c0_19 = arith.constant 0 : index
    %c0_20 = arith.constant 0 : index
    %c0_21 = arith.constant 0 : index
    %79 = vector.load %arg3[%c0_19, %c0_20, %c0_21] : memref<1x32x32xbf16, #tpu.memory_space<vmem>>, vector<1x32x32xbf16>
    %80 = vector.shape_cast %79 : vector<1x32x32xbf16> to vector<32x32xbf16>
    %cst_22 = arith.constant dense<0.000000e+00> : vector<16x32xf32>
    %81 = tpu.matmul %78, %80, %cst_22 {dimension_numbers = #tpu.dot_dimension_numbers<[1], [0], [0], [1], [0, 0, 1, 1], [], []>} : vector<16x32xbf16>, vector<32x32xbf16>, vector<16x32xf32> -> vector<16x32xf32>
    %82 = vector.broadcast %6 : vector<1x32xf32> to vector<16x32xf32>
    %83 = arith.addf %81, %82 : vector<16x32xf32>
    %84 = arith.addf %3, %83 : vector<16x32xf32>
    %cst_23 = arith.constant dense<0.000000e+00> : vector<16xf32>
    %85 = vector.multi_reduction <add>, %84, %cst_23 [1] : vector<16x32xf32> to vector<16xf32>
    %86 = vector.shape_cast %85 : vector<16xf32> to vector<16x1xf32>
    %cst_24 = arith.constant 3.200000e+01 : f32
    %87 = vector.broadcast %cst_24 : f32 to vector<16x1xf32>
    %88 = arith.divf %86, %87 : vector<16x1xf32>
    %89 = vector.broadcast %88 : vector<16x1xf32> to vector<16x32xf32>
    %90 = arith.subf %84, %89 : vector<16x32xf32>
    %91 = arith.mulf %90, %90 : vector<16x32xf32>
    %cst_25 = arith.constant dense<0.000000e+00> : vector<16xf32>
    %92 = vector.multi_reduction <add>, %91, %cst_25 [1] : vector<16x32xf32> to vector<16xf32>
    %93 = vector.shape_cast %92 : vector<16xf32> to vector<16x1xf32>
    %cst_26 = arith.constant 3.200000e+01 : f32
    %94 = vector.broadcast %cst_26 : f32 to vector<16x1xf32>
    %95 = arith.divf %93, %94 : vector<16x1xf32>
    %96 = vector.broadcast %88 : vector<16x1xf32> to vector<16x32xf32>
    %97 = arith.subf %84, %96 : vector<16x32xf32>
    %cst_27 = arith.constant 9.99999974E-6 : f32
    %98 = vector.broadcast %cst_27 : f32 to vector<16x1xf32>
    %99 = arith.addf %95, %98 : vector<16x1xf32>
    %100 = math.rsqrt %99 : vector<16x1xf32>
    %101 = vector.broadcast %100 : vector<16x1xf32> to vector<16x32xf32>
    %102 = arith.mulf %97, %101 : vector<16x32xf32>
    %103 = vector.broadcast %7 : vector<1x32xf32> to vector<16x32xf32>
    %104 = arith.mulf %102, %103 : vector<16x32xf32>
    %105 = vector.broadcast %8 : vector<1x32xf32> to vector<16x32xf32>
    %106 = arith.addf %104, %105 : vector<16x32xf32>
    %107 = arith.truncf %106 : vector<16x32xf32> to vector<16x32xbf16>
    %c0_28 = arith.constant 0 : index
    %c0_29 = arith.constant 0 : index
    %c0_30 = arith.constant 0 : index
    %108 = vector.load %arg4[%c0_28, %c0_29, %c0_30] : memref<1x32x64xbf16, #tpu.memory_space<vmem>>, vector<1x32x64xbf16>
    %109 = vector.shape_cast %108 : vector<1x32x64xbf16> to vector<32x64xbf16>
    %cst_31 = arith.constant dense<0.000000e+00> : vector<16x64xf32>
    %110 = tpu.matmul %107, %109, %cst_31 {dimension_numbers = #tpu.dot_dimension_numbers<[1], [0], [0], [1], [0, 0, 1, 1], [], []>} : vector<16x32xbf16>, vector<32x64xbf16>, vector<16x64xf32> -> vector<16x64xf32>
    %c0_32 = arith.constant 0 : index
    %c0_33 = arith.constant 0 : index
    %c0_34 = arith.constant 0 : index
    %111 = vector.load %arg8[%c0_32, %c0_33, %c0_34] : memref<1x1x64xf32, #tpu.memory_space<vmem>>, vector<1x1x64xf32>
    %112 = vector.shape_cast %111 : vector<1x1x64xf32> to vector<1x64xf32>
    %113 = vector.broadcast %112 : vector<1x64xf32> to vector<16x64xf32>
    %114 = arith.addf %110, %113 : vector<16x64xf32>
    %cst_35 = arith.constant 0.000000e+00 : f32
    %115 = vector.broadcast %cst_35 : f32 to vector<16x64xf32>
    %116 = arith.maximumf %114, %115 : vector<16x64xf32>
    %117 = arith.truncf %116 : vector<16x64xf32> to vector<16x64xbf16>
    %c0_36 = arith.constant 0 : index
    %c0_37 = arith.constant 0 : index
    %c0_38 = arith.constant 0 : index
    %118 = vector.load %arg5[%c0_36, %c0_37, %c0_38] : memref<1x64x32xbf16, #tpu.memory_space<vmem>>, vector<1x64x32xbf16>
    %119 = vector.shape_cast %118 : vector<1x64x32xbf16> to vector<64x32xbf16>
    %cst_39 = arith.constant dense<0.000000e+00> : vector<16x32xf32>
    %120 = tpu.matmul %117, %119, %cst_39 {dimension_numbers = #tpu.dot_dimension_numbers<[1], [0], [0], [1], [0, 0, 1, 1], [], []>} : vector<16x64xbf16>, vector<64x32xbf16>, vector<16x32xf32> -> vector<16x32xf32>
    %121 = vector.broadcast %9 : vector<1x32xf32> to vector<16x32xf32>
    %122 = arith.addf %120, %121 : vector<16x32xf32>
    %123 = arith.addf %106, %122 : vector<16x32xf32>
    %cst_40 = arith.constant dense<0.000000e+00> : vector<16xf32>
    %124 = vector.multi_reduction <add>, %123, %cst_40 [1] : vector<16x32xf32> to vector<16xf32>
    %125 = vector.shape_cast %124 : vector<16xf32> to vector<16x1xf32>
    %cst_41 = arith.constant 3.200000e+01 : f32
    %126 = vector.broadcast %cst_41 : f32 to vector<16x1xf32>
    %127 = arith.divf %125, %126 : vector<16x1xf32>
    %128 = vector.broadcast %127 : vector<16x1xf32> to vector<16x32xf32>
    %129 = arith.subf %123, %128 : vector<16x32xf32>
    %130 = arith.mulf %129, %129 : vector<16x32xf32>
    %cst_42 = arith.constant dense<0.000000e+00> : vector<16xf32>
    %131 = vector.multi_reduction <add>, %130, %cst_42 [1] : vector<16x32xf32> to vector<16xf32>
    %132 = vector.shape_cast %131 : vector<16xf32> to vector<16x1xf32>
    %cst_43 = arith.constant 3.200000e+01 : f32
    %133 = vector.broadcast %cst_43 : f32 to vector<16x1xf32>
    %134 = arith.divf %132, %133 : vector<16x1xf32>
    %135 = vector.broadcast %127 : vector<16x1xf32> to vector<16x32xf32>
    %136 = arith.subf %123, %135 : vector<16x32xf32>
    %cst_44 = arith.constant 9.99999974E-6 : f32
    %137 = vector.broadcast %cst_44 : f32 to vector<16x1xf32>
    %138 = arith.addf %134, %137 : vector<16x1xf32>
    %139 = math.rsqrt %138 : vector<16x1xf32>
    %140 = vector.broadcast %139 : vector<16x1xf32> to vector<16x32xf32>
    %141 = arith.mulf %136, %140 : vector<16x32xf32>
    %142 = vector.broadcast %10 : vector<1x32xf32> to vector<16x32xf32>
    %143 = arith.mulf %141, %142 : vector<16x32xf32>
    %144 = vector.broadcast %11 : vector<1x32xf32> to vector<16x32xf32>
    %145 = arith.addf %143, %144 : vector<16x32xf32>
    %c0_45 = arith.constant 0 : index
    %c0_46 = arith.constant 0 : index
    %146 = vector.load %arg12[%c0_45, %c0_46] : memref<16x32xf32, #tpu.memory_space<vmem>>, vector<16x32xf32>
    tpu.vector_store %arg12[%c0_45, %c0_46], %145 {strides = array<i32>} : memref<16x32xf32, #tpu.memory_space<vmem>>, vector<16x32xf32>,
    %c1_i32 = arith.constant 1 : i32
    %147 = arith.cmpi eq, %arg0, %c1_i32 : i32
    %148 = arith.extui %147 : i1 to i32
    %c0_i32_47 = arith.constant 0 : i32
    %149 = arith.cmpi ne, %148, %c0_i32_47 : i32
    scf.if %149 {
      %c0_48 = arith.constant 0 : index
      %c0_49 = arith.constant 0 : index
      %150 = vector.load %arg9[%c0_48, %c0_49] : memref<2x32xf32, #tpu.memory_space<vmem>>, vector<1x32xf32>
      %c1 = arith.constant 1 : index
      %c0_50 = arith.constant 0 : index
      %151 = vector.load %arg9[%c1, %c0_50] : memref<2x32xf32, #tpu.memory_space<vmem>>, vector<1x32xf32>
      %cst_51 = arith.constant dense<0.000000e+00> : vector<16xf32>
      %152 = vector.multi_reduction <add>, %145, %cst_51 [1] : vector<16x32xf32> to vector<16xf32>
      %153 = vector.shape_cast %152 : vector<16xf32> to vector<16x1xf32>
      %cst_52 = arith.constant 3.200000e+01 : f32
      %154 = vector.broadcast %cst_52 : f32 to vector<16x1xf32>
      %155 = arith.divf %153, %154 : vector<16x1xf32>
      %156 = vector.broadcast %155 : vector<16x1xf32> to vector<16x32xf32>
      %157 = arith.subf %145, %156 : vector<16x32xf32>
      %158 = arith.mulf %157, %157 : vector<16x32xf32>
      %cst_53 = arith.constant dense<0.000000e+00> : vector<16xf32>
      %159 = vector.multi_reduction <add>, %158, %cst_53 [1] : vector<16x32xf32> to vector<16xf32>
      %160 = vector.shape_cast %159 : vector<16xf32> to vector<16x1xf32>
      %cst_54 = arith.constant 3.200000e+01 : f32
      %161 = vector.broadcast %cst_54 : f32 to vector<16x1xf32>
      %162 = arith.divf %160, %161 : vector<16x1xf32>
      %163 = vector.broadcast %155 : vector<16x1xf32> to vector<16x32xf32>
      %164 = arith.subf %145, %163 : vector<16x32xf32>
      %cst_55 = arith.constant 9.99999974E-6 : f32
      %165 = vector.broadcast %cst_55 : f32 to vector<16x1xf32>
      %166 = arith.addf %162, %165 : vector<16x1xf32>
      %167 = math.rsqrt %166 : vector<16x1xf32>
      %168 = vector.broadcast %167 : vector<16x1xf32> to vector<16x32xf32>
      %169 = arith.mulf %164, %168 : vector<16x32xf32>
      %170 = vector.broadcast %150 : vector<1x32xf32> to vector<16x32xf32>
      %171 = arith.mulf %169, %170 : vector<16x32xf32>
      %172 = vector.broadcast %151 : vector<1x32xf32> to vector<16x32xf32>
      %173 = arith.addf %171, %172 : vector<16x32xf32>
      %c0_56 = arith.constant 0 : index
      %c0_57 = arith.constant 0 : index
      %174 = vector.load %arg10[%c0_56, %c0_57] : memref<16x32xf32, #tpu.memory_space<vmem>>, vector<16x32xf32>
      tpu.vector_store %arg10[%c0_56, %c0_57], %173 {strides = array<i32>} : memref<16x32xf32, #tpu.memory_space<vmem>>, vector<16x32xf32>,
    } else {
    }
    return
  }
  func.func @transform_0(%arg0: i32) -> (i32, i32) {
    %c0_i32 = arith.constant 0 : i32
    %c0_i32_0 = arith.constant 0 : i32
    %c0_i32_1 = arith.constant 0 : i32
    return %c0_i32, %c0_i32_0 : i32, i32
  }
  func.func @transform_1(%arg0: i32) -> (i32, i32, i32) {
    %c0_i32 = arith.constant 0 : i32
    %c0_i32_0 = arith.constant 0 : i32
    %c0_i32_1 = arith.constant 0 : i32
    return %arg0, %c0_i32, %c0_i32_0 : i32, i32, i32
  }
  func.func @transform_2(%arg0: i32) -> (i32, i32, i32) {
    %c0_i32 = arith.constant 0 : i32
    %c0_i32_0 = arith.constant 0 : i32
    %c0_i32_1 = arith.constant 0 : i32
    return %arg0, %c0_i32, %c0_i32_0 : i32, i32, i32
  }
  func.func @transform_3(%arg0: i32) -> (i32, i32, i32) {
    %c0_i32 = arith.constant 0 : i32
    %c0_i32_0 = arith.constant 0 : i32
    %c0_i32_1 = arith.constant 0 : i32
    return %arg0, %c0_i32, %c0_i32_0 : i32, i32, i32
  }
  func.func @transform_4(%arg0: i32) -> (i32, i32, i32) {
    %c0_i32 = arith.constant 0 : i32
    %c0_i32_0 = arith.constant 0 : i32
    %c0_i32_1 = arith.constant 0 : i32
    return %arg0, %c0_i32, %c0_i32_0 : i32, i32, i32
  }
  func.func @transform_5(%arg0: i32) -> (i32, i32, i32) {
    %c0_i32 = arith.constant 0 : i32
    %c0_i32_0 = arith.constant 0 : i32
    %c0_i32_1 = arith.constant 0 : i32
    return %arg0, %c0_i32, %c0_i32_0 : i32, i32, i32
  }
  func.func @transform_6(%arg0: i32) -> (i32, i32, i32) {
    %c0_i32 = arith.constant 0 : i32
    %c0_i32_0 = arith.constant 0 : i32
    %c0_i32_1 = arith.constant 0 : i32
    return %arg0, %c0_i32, %c0_i32_0 : i32, i32, i32
  }
  func.func @transform_7(%arg0: i32) -> (i32, i32, i32) {
    %c0_i32 = arith.constant 0 : i32
    %c0_i32_0 = arith.constant 0 : i32
    %c0_i32_1 = arith.constant 0 : i32
    return %arg0, %c0_i32, %c0_i32_0 : i32, i32, i32
  }
  func.func @transform_8(%arg0: i32) -> (i32, i32) {
    %c0_i32 = arith.constant 0 : i32
    %c0_i32_0 = arith.constant 0 : i32
    %c0_i32_1 = arith.constant 0 : i32
    return %c0_i32, %c0_i32_0 : i32, i32
  }
  func.func @transform_9(%arg0: i32) -> (i32, i32) {
    %c0_i32 = arith.constant 0 : i32
    %c0_i32_0 = arith.constant 0 : i32
    %c0_i32_1 = arith.constant 0 : i32
    return %c0_i32, %c0_i32_0 : i32, i32
  }
  func.func @transform_10(%arg0: i32) -> (i32, i32, i32, i32) {
    %c0_i32 = arith.constant 0 : i32
    %c0_i32_0 = arith.constant 0 : i32
    %c0_i32_1 = arith.constant 0 : i32
    %c0_i32_2 = arith.constant 0 : i32
    return %arg0, %c0_i32, %c0_i32_0, %c0_i32_1 : i32, i32, i32, i32
  }
}

</mosaic_0001>

<bundles_post_ra>
// kernel: tpu_custom_call.1
= control target key start
LH: loop header
LB: loop body
LE: loop exit
PB: predicated region body
PF: predicated region fallthrough
CT: control target
= control target key end

     0   :  { %s2370_s0 = inlined_call_operand.vmem [shape: f32[16,32], index: 0, kind: input, shape index: {}]   ;;  %s2371_s1 = inlined_call_operand.vmem [shape: bf16[2,32,96], index: 1, kind: input, shape index: {}]   ;;  %s2372_s2 = inlined_call_operand.vmem [shape: bf16[2,32,32], index: 2, kind: input, shape index: {}]   ;;  %s2373_s3 = inlined_call_operand.vmem [shape: bf16[2,32,64], index: 3, kind: input, shape index: {}]   ;;  %s2374_s4 = inlined_call_operand.vmem [shape: bf16[2,64,32], index: 4, kind: input, shape index: {}]   ;;  %s2375_s5 = inlined_call_operand.vmem [shape: f32[2,1,96], index: 5, kind: input, shape index: {}]   ;;  %s2376_s6 = inlined_call_operand.vmem [shape: f32[2,6,32], index: 6, kind: input, shape index: {}]   ;;  %s2377_s7 = inlined_call_operand.vmem [shape: f32[2,1,64], index: 7, kind: input, shape index: {}]   ;;  %s2378_s8 = inlined_call_operand.vmem [shape: f32[2,32], index: 8, kind: input, shape index: {}]   ;;  %s2379_s9 = inlined_call_operand.hbm [shape: f32[16,32], index: 9, kind: output, shape index: {0}]   ;;  %s2380_s10 = inlined_call_operand.hbm [shape: f32[2,8,8,8], index: 10, kind: output, shape index: {1}]  }
   0x1   :  { %2391 = sst [smem:[#allocation16_spill]] %s2371_s1 }
   0x2   :  { %2392 = sst [smem:[#allocation17_spill]] %s2372_s2 }
   0x3   :  { %2393 = sst [smem:[#allocation18_spill]] %s2380_s10 }
   0x4   :  { %16 = vsyncpa [#allocation4], 0 }
   0x5   :  { %17 = vsyncpa [#allocation6], 0 }
   0x6   :  { %19 = vsyncpa [#allocation6 + $0x1], 0  ;;  %s1995_s13 = smov 0   ;;  %s1997_s14 = smov 0  }
   0x7   :  { %s1999_s15 = smov 0   ;;  %s2001_s16 = smov 0  }
   0x8 LB: > { %2394 = sst [smem:[#allocation9_spill]] %s1915_s13  ;;  %s2016_s17 = sadd.s32 4294967295, %s1927_s16   ;;  %s1927_s16 = sphi %s2001_s16, %s2411_s16   ;;  %s1923_s15 = sphi %s1999_s15, %s2413_s15   ;;  %s1919_s14 = sphi %s1997_s14, %s2415_s14   ;;  %s1915_s13 = sphi %s1995_s13, %s2414_s13  }
   0x9   : > { %2395 = sst [smem:[#allocation10_spill]] %s1923_s15  ;;  %s1614_s18 = sadd.s32 4294967294, %s1927_s16  }
   0xa   : > { %2396 = sst [smem:[#allocation11_spill]] %s1927_s16  ;;  %s2020_s19 = sadd.s32 1, %s1927_s16  }
   0xb   : > { %2397 = sst [smem:[#allocation12_spill]] %s2020_s19  ;;  %s277_s20 = sadd.s32 1, %s1923_s15 }
   0xc   : > { %s274_s21 = ssub.s32 %s1927_s16, %s2020_s19  ;;  %p287_p0 = scmp.ne.s32.totalorder %s1923_s15, %s1919_s14 }
   0xd   : > { %p275_p1 = scmp.eq.s32.totalorder %s274_s21, 0  ;;  %p288_p2 = scmp.eq.s32.totalorder %s2016_s17, 1 }
   0xe   : > { %p293_p3 = scmp.ne.s32.totalorder %s1919_s14, %s1915_s13  ;;  %p294_p4 = scmp.eq.s32.totalorder %s1614_s18, 1 }
   0xf   : > { %s2031_s22 = scalar_select %p275_p1, %s1923_s15, %s277_s20  }
  0x10   : > { %p2035_p5 = por %p288_p2, %p287_p0  ;;  %p2039_p6 = por %p294_p4, %p293_p3 }
  0x11   : > { %2398 = sst [smem:[#allocation13_spill]] %s2031_s22  ;;  %p1617_p7 = scmp.ge.s32.totalorder %s1927_s16, 1 }
  0x12   : > { %s2399_s23 = scalar_select %p2035_p5, 1, 0 }
  0x13   : > { %s2401_s24 = scalar_select %p2039_p6, 1, 0 }
  0x14   : > { %2400 = sst [smem:[#allocation14_spill]] %s2399_s23  ;;  %p369_p8 = scmp.lt.s32.totalorder %s1927_s16, 3 }
  0x15   : > { %2402 = sst [smem:[#allocation15_spill]] %s2401_s24 }
  0x16   : > { %p370_p9 = pnand %p1617_p7, %p369_p8 }
  0x17   : > { %s2381_s25 = sand.u32 (!%p370_p9), 1, %s1919_s14   ;;  %p432_p10 = scmp.lt.s32.totalorder (!%p370_p9), %s2016_s17, 1 }
  0x18   : > { %373 = sbr.rel (%p370_p9) target bundleno = 2413 (0x96d), region = 56  ;;  %s1618_s26 = sshll.u32 (!%p370_p9), %s2381_s25, 6 }
  0x19   : > { %s2403_s1 = sld [smem:[#allocation16_spill]] (!%p370_p9)  ;;  %s2086_s25 = scalar_lea.vmem (!%p370_p9), [#allocation5], %s1618_s26 }
  0x1a   : > { %s2404_s2 = sld [smem:[#allocation17_spill]] (!%p370_p9)  ;;  %p1628_p11 = scmp.ne.s32.totalorder (!%p370_p9), %s2016_s17, 0 }
  0x1d   : > { %s2050_s27 = scalar_select %p432_p10, %s2016_s17, 1 }
  0x1f   : > { %s1697_s28 = sshll.u32 %s2050_s27, 4  ;;  %s1700_s29 = sshll.u32 %s2050_s27, 5 }
  0x20   : > { %s436_s12 = scalar_lea.vmem %s2403_s1, %s1697_s28  ;;  %s2060_s21 = scalar_lea.vmem %s2404_s2, %s1697_s28 }
  0x21   : > { %s2065_s15 = scalar_lea.vmem %s2373_s3, %s1697_s28  ;;  %s2070_s13 = scalar_lea.vmem %s2374_s4, %s1700_s29 }
  0x22   : > { %s454_s30 = scalar_lea.vmem %s2375_s5, %s2050_s27  ;;  %s1627_s11 = sshll.u32 %s2050_s27, 3 }
  0x23   : > { %s2080_s18 = scalar_lea.vmem %s2376_s6, %s1627_s11  ;;  %s461_s22 = scalar_lea.vmem %s2377_s7, %s2050_s27 }
  0x24   : > { %466 = sbr.rel (%p1628_p11) target bundleno = 44 (0x2c), region = 60 }
  0x29   : > { %v467_v0 = vld [vmem:[%s2370_s0] sm:$0xff]  ;;  %vm469_vm0 = vcmask 261120   ;;  %v468_v1 = vld [vmem:[%s2370_s0 + $0x8] sm:$0xff] }
  0x2a   : > { %470 = vst.msk [vmem:[#allocation2] sm:$0xff] %vm469_vm0, %v467_v0 }
  0x2b   : > { %471 = vst.msk [vmem:[#allocation2 + $0x8] sm:$0xff] %vm469_vm0, %v468_v1 }
  0x2c PF: > { %v1702_v2 = vld [vmem:[%s436_s12 + $0x8] sm:$0xff]  ;;  %v1701_v3 = vld [vmem:[%s436_s12] sm:$0xff]  ;;  %vm496_vm1 = vcmask 261120   ;;  %s1929_s1 = smov 104   ;;  %s1930_s2 = smov 120   ;;  %vm547_vm2 = vcmask 64512  }
  0x2d   : > { %506 = vmatpush.bf16.msra.mxu0 %v1702_v2  ;;  %v1783_v7 = vld [vmem:[%s454_s30] ss:$0 sm:$0xff]  ;;  %s1931_s23 = smov 112   ;;  %s1932_s26 = smov 96   ;;  %vm948_vm3 = vcmask 1043456  }
  0x2e   : > { %s1933_s28 = smov 64   ;;  %s1934_s29 = smov 8  }
  0x2f   : > { %s1935_s12 = smov 16   ;;  %s1936_s30 = smov 24  }
  0x30   : > { %p1689_p12 = scmp.ne.s32.totalorder %s2016_s17, 1 }
  0x31   : > { %v2095_v4 = vld [vmem:[#allocation2] sm:$0xff]  ;;  %507 = vmatpush.bf16.msra.mxu0 %v1701_v3 }
  0x32   : > { %v2097_v5 = vld [vmem:[#allocation2 + $0x8] sm:$0xff] }
  0x33   : > { %v475_v6 = vpack.c.bf16 %v2097_v5, %v2095_v4 }
  0x35   : > { %1637 = vmatmul.msk.bf16.vlgmr.msra.gmra.mxu0 %vm496_vm1, %v475_v6 }
  0xb2   : > { %v509_v8 = vpop.f32.mrf.mxu0 }
  0xb3   : > { %v510_v9 = vadd.f32 %v1783_v7, %v509_v8 }
  0xb5   : > { %528 = vrot.lane.b32.xlu1 %v510_v9, %s1929_s1  ;;  %516 = vrot.lane.b32.xlu0 %v510_v9, %s1930_s2  ;;  %v534_v32 = vpack.c.bf16 %v510_v9, %v510_v9 }
  0xb7   : > { %v543_v35 = vunpack.c.l.b16 %v534_v32 }
  0xb9   : > { %v2117_v37 = vpack.c.b16 %v543_v35, %v543_v35 }
  0xba   : > { %v511_v10 = vpop.f32.mrf.mxu0 }
  0xbb   : > { %v512_v11 = vadd.f32 %v1783_v7, %v511_v10 }
  0xbd   : > { %524 = vrot.lane.b32.xlu2 %v512_v11, %s1931_s23  ;;  %518 = vrot.lane.b32.xlu1 %v512_v11, %s1930_s2  ;;  %v538_v39 = vpack.c.bf16 %v512_v11, %v512_v11 }
  0xbe   : > { %522 = vrot.lane.b32.xlu0 %v510_v9, %s1931_s23 }
  0xbf   : > { %v640_v40 = vunpack.c.l.b16 %v538_v39 }
  0xc1   : > { %v2123_v41 = vpack.c.b16 %v640_v40, %v640_v40 }
  0xc5   : > { %530 = vrot.lane.b32.xlu2 %v512_v11, %s1929_s1 }
 0x117   : > { %v525_v12 = vpop.permute.xlu2 %524 }
 0x118   : > { %v540_v33 = vpack.c.bf16 %v525_v12, %v525_v12 }
 0x11a   : > { %v688_v36 = vunpack.c.l.b16 %v540_v33 }
 0x11c   : > { %v2119_v38 = vpack.c.b16 %v688_v36, %v688_v36 }
 0x11f   : > { %v531_v17 = vpop.permute.xlu2 %530 }
 0x120   : > { %v541_v20 = vpack.c.bf16 %v531_v17, %v531_v17 }
 0x122   : > { %v712_v24 = vunpack.c.l.b16 %v541_v20 }
 0x124   : > { %v2108_v30 = vpack.c.b16 %v712_v24, %v712_v24 }
 0x127   : > { %v529_v13 = vpop.permute.xlu1 %528  ;;  %v517_v14 = vpop.permute.xlu0 %516 }
 0x128   : > { %v537_v15 = vpack.c.bf16 %v529_v13, %v529_v13  ;;  %v535_v16 = vpack.c.bf16 %v517_v14, %v517_v14 }
 0x12a   : > { %v616_v18 = vunpack.c.l.b16 %v537_v15  ;;  %v568_v19 = vunpack.c.l.b16 %v535_v16 }
 0x12c   : > { %v2102_v21 = vpack.c.b16 %v616_v18, %v616_v18  ;;  %v2104_v22 = vpack.c.b16 %v568_v19, %v568_v19 }
 0x12e   : > { %618 = vrot.lane.b32.xlu2 %v2102_v21, %s1932_s26  ;;  %570 = vrot.lane.b32.xlu0 %v2104_v22, %s1932_s26 }
 0x12f   : > { %v519_v23 = vpop.permute.xlu1 %518 }
 0x130   : > { %v539_v25 = vpack.c.bf16 %v519_v23, %v519_v23  ;;  %v523_v26 = vpop.permute.xlu0 %522 }
 0x131   : > { %v536_v27 = vpack.c.bf16 %v523_v26, %v523_v26 }
 0x132   : > { %v664_v28 = vunpack.c.l.b16 %v539_v25 }
 0x133   : > { %v592_v29 = vunpack.c.l.b16 %v536_v27 }
 0x134   : > { %v2110_v31 = vpack.c.b16 %v664_v28, %v664_v28 }
 0x135   : > { %v2112_v34 = vpack.c.b16 %v592_v29, %v592_v29 }
 0x136   : > { %714 = vrot.lane.b32.xlu2 %v2108_v30, %s1932_s26  ;;  %666 = vrot.lane.b32.xlu0 %v2110_v31, %s1932_s26 }
 0x137   : > { %594 = vrot.lane.b32.xlu1 %v2112_v34, %s1932_s26 }
 0x13e   : > { %545 = vrot.lane.b32.xlu0 %v2117_v37, %s1932_s26 }
 0x13f   : > { %690 = vrot.lane.b32.xlu1 %v2119_v38, %s1932_s26 }
 0x147   : > { %642 = vrot.lane.b32.xlu1 %v2123_v41, %s1932_s26 }
 0x188   : > { %v619_v42 = vpop.permute.xlu2 %618 }
 0x189   : > { %v624_v43 = vsel %vm547_vm2, %v619_v42, 0 }
 0x18a   : > { %633 = vmatpush.bf16.xpose.msrb.mxu0 %v624_v43 }
 0x190   : > { %v715_v44 = vpop.permute.xlu2 %714 }
 0x191   : > { %v720_v45 = vsel %vm547_vm2, %v715_v44, 0  ;;  %1641 = vmatmul.msk.bf16.vlgmr.msrb.gmra.mxu0 %vm547_vm2, %v537_v15 }
 0x192   : > { %729 = vmatpush.bf16.xpose.msra.mxu0 %v720_v45 }
 0x1a0   : > { %v571_v46 = vpop.permute.xlu0 %570 }
 0x1a1   : > { %1645 = vmatmul.msk.bf16.vlgmr.msra.gmra.mxu0 %vm547_vm2, %v541_v20  ;;  %v576_v47 = vsel %vm547_vm2, %v571_v46, 0 }
 0x1a2   : > { %585 = vmatpush.bf16.xpose.msra.mxu2 %v576_v47 }
 0x1a8   : > { %v667_v48 = vpop.permute.xlu0 %666 }
 0x1a9   : > { %v595_v49 = vpop.permute.xlu1 %594  ;;  %1639 = vmatmul.msk.bf16.vlgmr.msra.gmra.mxu2 %vm547_vm2, %v535_v16  ;;  %v672_v50 = vsel %vm547_vm2, %v667_v48, 0 }
 0x1aa   : > { %v600_v51 = vsel %vm547_vm2, %v595_v49, 0  ;;  %681 = vmatpush.bf16.xpose.msrb.mxu2 %v672_v50 }
 0x1ab   : > { %609 = vmatpush.bf16.xpose.msra.mxu3 %v600_v51 }
 0x1b0   : > { %v546_v52 = vpop.permute.xlu0 %545 }
 0x1b1   : > { %v691_v53 = vpop.permute.xlu1 %690  ;;  %v552_v54 = vsel %vm547_vm2, %v546_v52, 0 }
 0x1b2   : > { %1640 = vmatmul.msk.bf16.vlgmr.msra.gmra.mxu3 %vm547_vm2, %v536_v27  ;;  %561 = vmatpush.bf16.xpose.msra.mxu1 %v552_v54  ;;  %v696_v55 = vsel %vm547_vm2, %v691_v53, 0 }
 0x1b3   : > { %705 = vmatpush.bf16.xpose.msrb.mxu3 %v696_v55 }
 0x1b9   : > { %v643_v56 = vpop.permute.xlu1 %642  ;;  %1638 = vmatmul.msk.bf16.vlgmr.msra.gmra.mxu1 %vm547_vm2, %v534_v32  ;;  %1643 = vmatmul.msk.bf16.vlgmr.msrb.gmra.mxu2 %vm547_vm2, %v539_v25 }
 0x1ba   : > { %v648_v57 = vsel %vm547_vm2, %v643_v56, 0 }
 0x1bb   : > { %657 = vmatpush.bf16.xpose.msrb.mxu1 %v648_v57 }
 0x1c2   : > { %1644 = vmatmul.msk.bf16.vlgmr.msrb.gmra.mxu3 %vm547_vm2, %v540_v33 }
 0x1c9   : > { %1642 = vmatmul.msk.bf16.vlgmr.msrb.gmra.mxu1 %vm547_vm2, %v538_v39 }
 0x20e   : > { %v635_v58 = vpop.f32.mrf.mxu0 }
 0x20f   : > { %v744_v59 = vsel %vm547_vm2, %v635_v58, -inf }
 0x210   : > { %745 = vmax.xlane.f32.xlu1 %v744_v59 }
 0x216   : > { %v637_v60 = vpop.f32.mrf.mxu0 }
 0x21e   : > { %v731_v61 = vpop.f32.mrf.mxu0 }
 0x21f   : > { %v756_v9 = vsel %vm547_vm2, %v731_v61, -inf }
 0x226   : > { %v733_v62 = vpop.f32.mrf.mxu0 }
 0x22c   : > { %v587_v63 = vpop.f32.mrf.mxu2 }
 0x22d   : > { %v738_v17 = vsel %vm547_vm2, %v587_v63, -inf }
 0x234   : > { %v589_v0 = vpop.f32.mrf.mxu2 }
 0x235   : > { %v611_v1 = vpop.f32.mrf.mxu3 }
 0x236   : > { %v741_v2 = vsel %vm547_vm2, %v611_v1, -inf  ;;  %v2144_v3 = vpop.f32.mrf.mxu1 }
 0x237   : > { %742 = vmax.xlane.f32.xlu0 %v741_v2  ;;  %v735_v6 = vsel %vm547_vm2, %v2144_v3, -inf }
 0x238   : > { %736 = vmax.xlane.f32.xlu1 %v735_v6 }
 0x23c   : > { %v683_v7 = vpop.f32.mrf.mxu2 }
 0x23d   : > { %v613_v8 = vpop.f32.mrf.mxu3  ;;  %v750_v18 = vsel %vm547_vm2, %v683_v7, -inf }
 0x23e   : > { %v565_v10 = vpop.f32.mrf.mxu1 }
 0x23f   : > { %757 = vmax.xlane.f32.xlu0 %v756_v9 }
 0x244   : > { %v685_v11 = vpop.f32.mrf.mxu2 }
 0x245   : > { %v707_v12 = vpop.f32.mrf.mxu3 }
 0x246   : > { %v2149_v13 = vpop.f32.mrf.mxu1  ;;  %v753_v19 = vsel %vm547_vm2, %v707_v12, -inf }
 0x247   : > { %v747_v14 = vsel %vm547_vm2, %v2149_v13, -inf }
 0x248   : > { %748 = vmax.xlane.f32.xlu2 %v747_v14 }
 0x24d   : > { %v709_v15 = vpop.f32.mrf.mxu3 }
 0x24e   : > { %v661_v16 = vpop.f32.mrf.mxu1 }
 0x250   : > { %739 = vmax.xlane.f32.xlu2 %v738_v17 }
 0x253   : > { %986 = vrot.lane.b32.xlu0 %v2112_v34, %s1933_s28 }
 0x258   : > { %751 = vmax.xlane.f32.xlu2 %v750_v18 }
 0x260   : > { %754 = vmax.xlane.f32.xlu2 %v753_v19 }
 0x278   : > { %965 = vrot.lane.b32.xlu2 %v2104_v22, %s1933_s28 }
 0x283   : > { %v746_v20 = vpop.xlane.xlu1 %745 }
 0x284   : > { %v762_v23 = vsub.f32 %v635_v58, %v746_v20 }
 0x286   : > { %v773_v24 = vmul.f32 1.442695, %v762_v23 }
 0x288   : > { %1785 = vpow2.f32 %v773_v24 }
 0x28e   : > { %v2160_v25 = vpop.eup %1785 }
 0x28f   : > { %v792_v26 = vsel %vm547_vm2, %v2160_v25, 0.0 }
 0x290   : > { %793 = vadd.xlane.f32.xlu1 %v792_v26 }
 0x2aa   : > { %v743_v27 = vpop.xlane.xlu0 %742 }
 0x2ab   : > { %v761_v28 = vsub.f32 %v611_v1, %v743_v27 }
 0x2ad   : > { %v771_v29 = vmul.f32 1.442695, %v761_v28 }
 0x2af   : > { %1787 = vpow2.f32 %v771_v29 }
 0x2b2   : > { %v758_v32 = vpop.xlane.xlu0 %757 }
 0x2b3   : > { %v766_v33 = vsub.f32 %v731_v61, %v758_v32  ;;  %v737_v61 = vpop.xlane.xlu1 %736 }
 0x2b4   : > { %v759_v62 = vsub.f32 %v2144_v3, %v737_v61 }
 0x2b5   : > { %v2164_v34 = vpop.eup %1787  ;;  %v781_v35 = vmul.f32 1.442695, %v766_v33 }
 0x2b6   : > { %v789_v22 = vsel %vm547_vm2, %v2164_v34, 0.0 }
 0x2b7   : > { %1789 = vpow2.f32 %v781_v35  ;;  %790 = vadd.xlane.f32.xlu0 %v789_v22 }
 0x2bb   : > { %v2168_v36 = vpop.xlane.xlu2 %748 }
 0x2bc   : > { %v763_v3 = vsub.f32 %v2149_v13, %v2168_v36 }
 0x2bd   : > { %v2170_v39 = vpop.eup %1789 }
 0x2be   : > { %v804_v40 = vsel %vm547_vm2, %v2170_v39, 0.0  ;;  %v775_v10 = vmul.f32 1.442695, %v763_v3 }
 0x2bf   : > { %805 = vadd.xlane.f32.xlu1 %v804_v40 }
 0x2c3   : > { %v740_v42 = vpop.xlane.xlu2 %739 }
 0x2c4   : > { %v760_v43 = vsub.f32 %v587_v63, %v740_v42  ;;  %v767_v63 = vmul.f32 1.442695, %v759_v62 }
 0x2c5   : > { %v987_v44 = vpop.permute.xlu0 %986 }
 0x2c6   : > { %v769_v45 = vmul.f32 1.442695, %v760_v43  ;;  %v992_v46 = vsel %vm948_vm3, %v987_v44, 0 }
 0x2c7   : > { %1001 = vmatpush.bf16.msra.mxu3 %v992_v46 }
 0x2c8   : > { %1791 = vpow2.f32 %v769_v45 }
 0x2cb   : > { %v752_v47 = vpop.xlane.xlu2 %751 }
 0x2cc   : > { %v764_v48 = vsub.f32 %v683_v7, %v752_v47 }
 0x2ce   : > { %v2175_v49 = vpop.eup %1791  ;;  %v777_v50 = vmul.f32 1.442695, %v764_v48 }
 0x2cf   : > { %v786_v51 = vsel %vm547_vm2, %v2175_v49, 0.0 }
 0x2d0   : > { %1793 = vpow2.f32 %v777_v50  ;;  %787 = vadd.xlane.f32.xlu2 %v786_v51 }
 0x2d3   : > { %v755_v52 = vpop.xlane.xlu2 %754 }
 0x2d4   : > { %v765_v53 = vsub.f32 %v707_v12, %v755_v52 }
 0x2d6   : > { %v2179_v54 = vpop.eup %1793  ;;  %v779_v55 = vmul.f32 1.442695, %v765_v53 }
 0x2d7   : > { %v798_v56 = vsel %vm547_vm2, %v2179_v54, 0.0 }
 0x2d8   : > { %1795 = vpow2.f32 %v779_v55  ;;  %799 = vadd.xlane.f32.xlu0 %v798_v56 }
 0x2db   : > { %v966_v57 = vpop.permute.xlu2 %965 }
 0x2dc   : > { %v971_v58 = vsel %vm948_vm3, %v966_v57, 0 }
 0x2dd   : > { %980 = vmatpush.bf16.msra.mxu2 %v971_v58 }
 0x2de   : > { %v2184_v59 = vpop.eup %1795 }
 0x2df   : > { %v801_v60 = vsel %vm547_vm2, %v2184_v59, 0.0 }
 0x2e0   : > { %802 = vadd.xlane.f32.xlu1 %v801_v60 }
 0x2e8   : > { %1070 = vrot.lane.b32.xlu2 %v2119_v38, %s1933_s28 }
 0x2ec   : > { %1049 = vrot.lane.b32.xlu0 %v2110_v31, %s1933_s28 }
 0x2f4   : > { %1091 = vrot.lane.b32.xlu0 %v2108_v30, %s1933_s28 }
 0x2f9   : > { %1007 = vrot.lane.b32.xlu1 %v2102_v21, %s1933_s28 }
 0x2fc   : > { %943 = vrot.lane.b32.xlu0 %v2117_v37, %s1933_s28 }
 0x303   : > { %v794_v0 = vpop.xlane.xlu1 %793 }
 0x304   : > { %1797 = vrcp.f32 %v794_v0  ;;  %1028 = vrot.lane.b32.xlu0 %v2123_v41, %s1933_s28  ;;  %v863_v2 = vand.u32 2147483648, %v794_v0  ;;  %v861_v6 = vand.u32 2147483647, %v794_v0  ;;  %vm857_vm5 = vweird.f32 %v794_v0 }
 0x305   : > { %1799 = vpow2.f32 %v767_v63 }
 0x306   : > { %v864_v41 = vor.u32 1.1754944e-38, %v863_v2  ;;  %vm862_vm7 = vcmp.eq.f32.partialorder %v861_v6, 8.507059e+37  ;;  %1801 = vpow2.f32 %v775_v10 }
 0x30a   : > { %v1798_v31 = vpop.eup %1797 }
 0x30b   : > { %v853_v38 = vmul.f32 %v1798_v31, %v794_v0  ;;  %v2201_v1 = vpop.eup %1799  ;;  %vm858_vm4 = vweird.f32 %v1798_v31 }
 0x30c   : > { %v783_v37 = vsel %vm547_vm2, %v2201_v1, 0.0  ;;  %vm859_vm6 = vmor %vm857_vm5, %vm858_vm4  ;;  %v2213_v12 = vpop.eup %1801 }
 0x30d   : > { %v854_v30 = vsub.f32 1.0, %v853_v38  ;;  %v795_v13 = vsel %vm547_vm2, %v2213_v12, 0.0 }
 0x30f   : > { %v855_v21 = vmul.f32 %v1798_v31, %v854_v30 }
 0x311   : > { %v856_v7 = vadd.f32 %v1798_v31, %v855_v21  ;;  %784 = vadd.xlane.f32.xlu2 %v783_v37 }
 0x313   : > { %v860_v8 = vsel %vm859_vm6, %v1798_v31, %v856_v7 }
 0x314   : > { %v865_v9 = vsel %vm862_vm7, %v864_v41, %v860_v8 }
 0x315   : > { %v2208_v11 = vmul.f32 %v2160_v25, %v865_v9 }
 0x317   : > { %930 = vst.msk [vmem:[%s2086_s25 + $0x18] sm:$0xff] %vm547_vm2, %v2208_v11 }
 0x323   : > { %796 = vadd.xlane.f32.xlu1 %v795_v13 }
 0x32a   : > { %v791_v14 = vpop.xlane.xlu0 %790 }
 0x32b   : > { %1803 = vrcp.f32 %v791_v14  ;;  %v848_v19 = vand.u32 2147483648, %v791_v14  ;;  %v846_v23 = vand.u32 2147483647, %v791_v14  ;;  %vm842_vm9 = vweird.f32 %v791_v14 }
 0x32d   : > { %v849_v26 = vor.u32 1.1754944e-38, %v848_v19  ;;  %vm847_vm11 = vcmp.eq.f32.partialorder %v846_v23, 8.507059e+37 }
 0x331   : > { %v1804_v15 = vpop.eup %1803 }
 0x332   : > { %v838_v16 = vmul.f32 %v1804_v15, %v791_v14  ;;  %v806_v17 = vpop.xlane.xlu1 %805  ;;  %vm843_vm8 = vweird.f32 %v1804_v15 }
 0x333   : > { %1805 = vrcp.f32 %v806_v17  ;;  %vm844_vm10 = vmor %vm842_vm9, %vm843_vm8  ;;  %v923_v35 = vand.u32 2147483648, %v806_v17  ;;  %v921_v36 = vand.u32 2147483647, %v806_v17  ;;  %vm917_vm13 = vweird.f32 %v806_v17 }
 0x334   : > { %v839_v18 = vsub.f32 1.0, %v838_v16 }
 0x335   : > { %v924_v43 = vor.u32 1.1754944e-38, %v923_v35  ;;  %vm922_vm15 = vcmp.eq.f32.partialorder %v921_v36, 8.507059e+37 }
 0x336   : > { %v840_v20 = vmul.f32 %v1804_v15, %v839_v18 }
 0x338   : > { %v841_v24 = vadd.f32 %v1804_v15, %v840_v20 }
 0x339   : > { %v1806_v25 = vpop.eup %1805 }
 0x33a   : > { %v845_v27 = vsel %vm844_vm10, %v1804_v15, %v841_v24  ;;  %v913_v28 = vmul.f32 %v1806_v25, %v806_v17  ;;  %vm918_vm12 = vweird.f32 %v1806_v25 }
 0x33b   : > { %v850_v29 = vsel %vm847_vm11, %v849_v26, %v845_v27  ;;  %vm919_vm14 = vmor %vm917_vm13, %vm918_vm12 }
 0x33c   : > { %v851_v32 = vmul.f32 %v2164_v34, %v850_v29  ;;  %v914_v33 = vsub.f32 1.0, %v913_v28 }
 0x33e   : > { %929 = vst.msk [vmem:[%s2086_s25 + $0x10] sm:$0xff] %vm547_vm2, %v851_v32  ;;  %v915_v22 = vmul.f32 %v1806_v25, %v914_v33  ;;  %v937_v40 = vpack.c.bf16 %v851_v32, %v851_v32 }
 0x340   : > { %v916_v42 = vadd.f32 %v1806_v25, %v915_v22  ;;  %1648 = vmatmul.msk.bf16.vlgmr.msra.gmra.mxu3 %vm547_vm2, %v937_v40 }
 0x342   : > { %v920_v44 = vsel %vm919_vm14, %v1806_v25, %v916_v42 }
 0x343   : > { %v925_v45 = vsel %vm922_vm15, %v924_v43, %v920_v44  ;;  %v788_v46 = vpop.xlane.xlu2 %787 }
 0x344   : > { %v2222_v34 = vmul.f32 %v2170_v39, %v925_v45  ;;  %1807 = vrcp.f32 %v788_v46  ;;  %v833_v55 = vand.u32 2147483648, %v788_v46  ;;  %v831_v57 = vand.u32 2147483647, %v788_v46 }
 0x345   : > { %vm827_vm4 = vweird.f32 %v788_v46 }
 0x346   : > { %934 = vst.msk [vmem:[%s2086_s25 + $0x38] sm:$0xff] %vm547_vm2, %v2222_v34  ;;  %v834_v60 = vor.u32 1.1754944e-38, %v833_v55  ;;  %vm832_vm6 = vcmp.eq.f32.partialorder %v831_v57, 8.507059e+37  ;;  %v942_v36 = vpack.c.bf16 %v2222_v34, %v2222_v34 }
 0x34a   : > { %v1808_v47 = vpop.eup %1807 }
 0x34b   : > { %v823_v48 = vmul.f32 %v1808_v47, %v788_v46  ;;  %v1071_v50 = vpop.permute.xlu2 %1070  ;;  %v800_v51 = vpop.xlane.xlu0 %799  ;;  %vm828_vm0 = vweird.f32 %v1808_v47 }
 0x34c   : > { %v1076_v52 = vsel %vm948_vm3, %v1071_v50, 0  ;;  %1809 = vrcp.f32 %v800_v51  ;;  %vm829_vm5 = vmor %vm827_vm4, %vm828_vm0  ;;  %v893_v30 = vand.u32 2147483648, %v800_v51  ;;  %v891_v21 = vand.u32 2147483647, %v800_v51 }
 0x34d   : > { %v824_v53 = vsub.f32 1.0, %v823_v48  ;;  %1085 = vmatpush.bf16.msrb.mxu3 %v1076_v52  ;;  %vm887_vm8 = vweird.f32 %v800_v51 }
 0x34e   : > { %v894_v7 = vor.u32 1.1754944e-38, %v893_v30  ;;  %vm892_vm10 = vcmp.eq.f32.partialorder %v891_v21, 8.507059e+37 }
 0x34f   : > { %v825_v56 = vmul.f32 %v1808_v47, %v824_v53 }
 0x351   : > { %v826_v39 = vadd.f32 %v1808_v47, %v825_v56 }
 0x352   : > { %v1810_v58 = vpop.eup %1809 }
 0x353   : > { %v830_v61 = vsel %vm829_vm5, %v1808_v47, %v826_v39  ;;  %v883_v62 = vmul.f32 %v1810_v58, %v800_v51  ;;  %v803_v63 = vpop.xlane.xlu1 %802  ;;  %vm888_vm7 = vweird.f32 %v1810_v58 }
 0x354   : > { %v835_v0 = vsel %vm832_vm6, %v834_v60, %v830_v61  ;;  %1811 = vrcp.f32 %v803_v63  ;;  %vm889_vm9 = vmor %vm887_vm8, %vm888_vm7  ;;  %v908_v13 = vand.u32 2147483648, %v803_v63  ;;  %v906_v16 = vand.u32 2147483647, %v803_v63 }
 0x355   : > { %v836_v31 = vmul.f32 %v2175_v49, %v835_v0  ;;  %v884_v38 = vsub.f32 1.0, %v883_v62  ;;  %vm902_vm12 = vweird.f32 %v803_v63 }
 0x356   : > { %v909_v19 = vor.u32 1.1754944e-38, %v908_v13  ;;  %vm907_vm14 = vcmp.eq.f32.partialorder %v906_v16, 8.507059e+37 }
 0x357   : > { %928 = vst.msk [vmem:[%s2086_s25 + $0x8] sm:$0xff] %vm547_vm2, %v836_v31  ;;  %v885_v2 = vmul.f32 %v1810_v58, %v884_v38  ;;  %v936_v6 = vpack.c.bf16 %v836_v31, %v836_v31 }
 0x359   : > { %v886_v37 = vadd.f32 %v1810_v58, %v885_v2  ;;  %1647 = vmatmul.msk.bf16.vlgmr.msra.gmra.mxu2 %vm547_vm2, %v936_v6 }
 0x35a   : > { %v1812_v3 = vpop.eup %1811 }
 0x35b   : > { %v890_v41 = vsel %vm889_vm9, %v1810_v58, %v886_v37  ;;  %v898_v8 = vmul.f32 %v1812_v3, %v803_v63  ;;  %vm903_vm11 = vweird.f32 %v1812_v3  ;;  %vm1138_vm9 = vcmask 130048  }
 0x35c   : > { %v895_v49 = vsel %vm892_vm10, %v894_v7, %v890_v41  ;;  %vm904_vm13 = vmor %vm902_vm12, %vm903_vm11  ;;  %vm1141_vm10 = vcmask 195584  }
 0x35d   : > { %v896_v9 = vmul.f32 %v2179_v54, %v895_v49  ;;  %v899_v10 = vsub.f32 1.0, %v898_v8 }
 0x35e   : > { %v1050_v14 = vpop.permute.xlu0 %1049 }
 0x35f   : > { %932 = vst.msk [vmem:[%s2086_s25 + $0x28] sm:$0xff] %vm547_vm2, %v896_v9  ;;  %v900_v15 = vmul.f32 %v1812_v3, %v899_v10  ;;  %v1055_v17 = vsel %vm948_vm3, %v1050_v14, 0  ;;  %v940_v25 = vpack.c.bf16 %v896_v9, %v896_v9 }
 0x360   : > { %1064 = vmatpush.bf16.msrb.mxu2 %v1055_v17 }
 0x361   : > { %v901_v18 = vadd.f32 %v1812_v3, %v900_v15 }
 0x363   : > { %v905_v20 = vsel %vm904_vm13, %v1812_v3, %v901_v18  ;;  %v1704_v18 = vld [vmem:[%s2060_s21 + $0x8] sm:$0xff] }
 0x364   : > { %v910_v23 = vsel %vm907_vm14, %v909_v19, %v905_v20  ;;  %v1703_v19 = vld [vmem:[%s2060_s21] sm:$0xff] }
 0x365   : > { %v911_v54 = vmul.f32 %v2184_v59, %v910_v23  ;;  %v938_v59 = vpack.c.bf16 %v2208_v11, %v2208_v11 }
 0x366   : > { %v1092_v24 = vpop.permute.xlu0 %1091 }
 0x367   : > { %933 = vst.msk [vmem:[%s2086_s25 + $0x30] sm:$0xff] %vm547_vm2, %v911_v54  ;;  %v941_v26 = vpack.c.bf16 %v911_v54, %v911_v54  ;;  %v1097_v29 = vsel %vm948_vm3, %v1092_v24, 0 }
 0x369   : > { %1651 = vmatmul.msk.bf16.vlgmr.msrb.gmra.mxu2 %vm547_vm2, %v940_v25  ;;  %1652 = vmatmul.msk.bf16.vlgmr.msrb.gmra.mxu3 %vm547_vm2, %v941_v26 }
 0x36b   : > { %v1008_v27 = vpop.permute.xlu1 %1007 }
 0x36c   : > { %v1013_v28 = vsel %vm948_vm3, %v1008_v27, 0 }
 0x36d   : > { %1022 = vmatpush.bf16.msrb.mxu0 %v1013_v28 }
 0x36e   : > { %v944_v32 = vpop.permute.xlu0 %943 }
 0x36f   : > { %v950_v33 = vsel %vm948_vm3, %v944_v32, 0 }
 0x370   : > { %959 = vmatpush.bf16.msra.mxu1 %v950_v33  ;;  %1649 = vmatmul.msk.bf16.vlgmr.msrb.gmra.mxu0 %vm547_vm2, %v938_v59 }
 0x371   : > { %1106 = vmatpush.bf16.msra.mxu0 %v1097_v29 }
 0x376   : > { %v1029_v35 = vpop.permute.xlu0 %1028 }
 0x377   : > { %v1034_v22 = vsel %vm948_vm3, %v1029_v35, 0 }
 0x378   : > { %1043 = vmatpush.bf16.msrb.mxu1 %v1034_v22 }
 0x380   : > { %1653 = vmatmul.msk.bf16.vlgmr.msra.gmra.mxu0 %vm547_vm2, %v942_v36 }
 0x384   : > { %v785_v40 = vpop.xlane.xlu2 %784 }
 0x385   : > { %1813 = vrcp.f32 %v785_v40  ;;  %v818_v44 = vand.u32 2147483648, %v785_v40  ;;  %v816_v46 = vand.u32 2147483647, %v785_v40  ;;  %vm812_vm0 = vweird.f32 %v785_v40 }
 0x387   : > { %v819_v48 = vor.u32 1.1754944e-38, %v818_v44  ;;  %vm817_vm3 = vcmp.eq.f32.partialorder %v816_v46, 8.507059e+37 }
 0x38b   : > { %v1814_v42 = vpop.eup %1813 }
 0x38c   : > { %v808_v43 = vmul.f32 %v1814_v42, %v785_v40  ;;  %vm813_vm15 = vweird.f32 %v1814_v42 }
 0x38d   : > { %vm814_vm4 = vmor %vm812_vm0, %vm813_vm15 }
 0x38e   : > { %v809_v11 = vsub.f32 1.0, %v808_v43 }
 0x390   : > { %v810_v45 = vmul.f32 %v1814_v42, %v809_v11 }
 0x392   : > { %v811_v47 = vadd.f32 %v1814_v42, %v810_v45 }
 0x394   : > { %v815_v50 = vsel %vm814_vm4, %v1814_v42, %v811_v47  ;;  %v2266_v42 = vld [vmem:[%s2080_s18] sm:$0x3f]  ;;  %vm1312_vm4 = vcmask 523264  }
 0x395   : > { %v820_v51 = vsel %vm817_vm3, %v819_v48, %v815_v50  ;;  %v1149_v43 = vperm.slane %v2266_v42, 0 }
 0x396   : > { %v821_v34 = vmul.f32 %v2201_v1, %v820_v51  ;;  %v797_v52 = vpop.xlane.xlu1 %796 }
 0x397   : > { %1815 = vrcp.f32 %v797_v52  ;;  %v878_v39 = vand.u32 2147483648, %v797_v52  ;;  %v876_v60 = vand.u32 2147483647, %v797_v52  ;;  %vm872_vm6 = vweird.f32 %v797_v52 }
 0x398   : > { %927 = vst.msk [vmem:[%s2086_s25] sm:$0xff] %vm547_vm2, %v821_v34  ;;  %v935_v53 = vpack.c.bf16 %v821_v34, %v821_v34  ;;  %v1937_v34 = vmov 32.0  }
 0x399   : > { %v879_v62 = vor.u32 1.1754944e-38, %v878_v39  ;;  %vm877_vm8 = vcmp.eq.f32.partialorder %v876_v60, 8.507059e+37  ;;  %1817 = vrcp.f32 %v1937_v34 }
 0x39a   : > { %1646 = vmatmul.msk.bf16.vlgmr.msra.gmra.mxu1 %vm547_vm2, %v935_v53 }
 0x39b   : > { %1171 = vmatpush.bf16.msra.mxu1 %v1704_v18 }
 0x39d   : > { %v1816_v55 = vpop.eup %1815 }
 0x39e   : > { %v868_v56 = vmul.f32 %v1816_v55, %v797_v52  ;;  %vm873_vm5 = vweird.f32 %v1816_v55 }
 0x39f   : > { %vm874_vm7 = vmor %vm872_vm6, %vm873_vm5  ;;  %1172 = vmatpush.bf16.msra.mxu1 %v1703_v19  ;;  %v1818_v52 = vpop.eup %1817  ;;  %v1232_v19 = vperm.slane %v2266_v42, 1 }
 0x3a0   : > { %v869_v57 = vsub.f32 1.0, %v868_v56  ;;  %v1188_v53 = vmul.f32 32.0, %v1818_v52 }
 0x3a2   : > { %v870_v58 = vmul.f32 %v1816_v55, %v869_v57 }
 0x3a4   : > { %v871_v61 = vadd.f32 %v1816_v55, %v870_v58 }
 0x3a6   : > { %v875_v1 = vsel %vm874_vm7, %v1816_v55, %v871_v61  ;;  %v1189_v55 = vsub.f32 1.0, %v1188_v53 }
 0x3a7   : > { %v880_v63 = vsel %vm877_vm8, %v879_v62, %v875_v1 }
 0x3a8   : > { %v881_v0 = vmul.f32 %v2213_v12, %v880_v63  ;;  %v1190_v56 = vmul.f32 %v1818_v52, %v1189_v55 }
 0x3aa   : > { %931 = vst.msk [vmem:[%s2086_s25 + $0x20] sm:$0xff] %vm547_vm2, %v881_v0  ;;  %v939_v31 = vpack.c.bf16 %v881_v0, %v881_v0  ;;  %v1191_v57 = vadd.f32 %v1818_v52, %v1190_v56 }
 0x3ac   : > { %1650 = vmatmul.msk.bf16.vlgmr.msrb.gmra.mxu1 %vm547_vm2, %v939_v31 }
 0x3c3   : > { %v1003_v38 = vpop.f32.mrf.mxu3 }
 0x3cb   : > { %v1005_v30 = vpop.f32.mrf.mxu3 }
 0x3dc   : > { %v982_v2 = vpop.f32.mrf.mxu2 }
 0x3e4   : > { %v984_v21 = vpop.f32.mrf.mxu2 }
 0x3ec   : > { %v1066_v6 = vpop.f32.mrf.mxu2  ;;  %v1087_v37 = vpop.f32.mrf.mxu3 }
 0x3ed   : > { %v1768_v3 = vpack.i.bf16 %v1066_v6, %v982_v2  ;;  %v1024_v7 = vpop.f32.mrf.mxu0  ;;  %v1773_v12 = vpack.i.bf16 %v1087_v37, %v1003_v38  ;;  %v1706_v38 = vld [vmem:[%s2065_s15 + $0x8] sm:$0xff]  ;;  %v1705_v6 = vld [vmem:[%s2065_s15] sm:$0xff] }
 0x3ee   : > { %1268 = vmatpush.bf16.msra.mxu2 %v1706_v38 }
 0x3ef   : > { %1769 = vrot.lane.b32.xlu0 %v1768_v3, %s1934_s29 }
 0x3f2   : > { %1269 = vmatpush.bf16.msra.mxu2 %v1705_v6 }
 0x3f4   : > { %v1068_v41 = vpop.f32.mrf.mxu2  ;;  %v1089_v8 = vpop.f32.mrf.mxu3 }
 0x3f5   : > { %v1026_v49 = vpop.f32.mrf.mxu0 }
 0x3f7   : > { %1774 = vrot.lane.b32.xlu0 %v1773_v12, %s1935_s12 }
 0x3fd   : > { %v1108_v9 = vpop.f32.mrf.mxu0 }
 0x3fe   : > { %v1778_v10 = vpack.i.bf16 %v1108_v9, %v1024_v7 }
 0x400   : > { %1779 = vrot.lane.b32.xlu0 %v1778_v10, %s1936_s30 }
 0x405   : > { %v1110_v13 = vpop.f32.mrf.mxu0 }
 0x417   : > { %v961_v14 = vpop.f32.mrf.mxu1 }
 0x41f   : > { %v963_v15 = vpop.f32.mrf.mxu1 }
 0x429   : > { %v1045_v16 = vpop.f32.mrf.mxu1 }
 0x431   : > { %v1047_v17 = vpop.f32.mrf.mxu1 }
 0x461   : > { %v1770_v20 = vpop.permute.xlu0 %1769 }
 0x462   : > { %v1772_v54 = vunpack.i.h.bf16 %v1770_v20  ;;  %v1771_v24 = vunpack.i.l.bf16 %v1770_v20 }
 0x464   : > { %v1137_v28 = vsel %vm547_vm2, %v1045_v16, %v1772_v54  ;;  %v1136_v29 = vsel %vm547_vm2, %v961_v14, %v1771_v24  ;;  %vm1192_vm2 = vweird.f32 %v1818_v52  ;;  %v1235_v24 = vperm.slane %v2266_v42, 2 }
 0x469   : > { %v1775_v23 = vpop.permute.xlu0 %1774 }
 0x46a   : > { %v1777_v25 = vunpack.i.h.bf16 %v1775_v23  ;;  %v1776_v26 = vunpack.i.l.bf16 %v1775_v23 }
 0x46c   : > { %v1139_v33 = vsel %vm1138_vm9, %v1136_v29, %v1776_v26  ;;  %v1140_v35 = vsel %vm1138_vm9, %v1137_v28, %v1777_v25 }
 0x472   : > { %v1780_v27 = vpop.permute.xlu0 %1779 }
 0x473   : > { %v1782_v32 = vunpack.i.h.bf16 %v1780_v27  ;;  %v1781_v59 = vunpack.i.l.bf16 %v1780_v27 }
 0x475   : > { %v1142_v22 = vsel %vm1141_vm10, %v1139_v33, %v1781_v59  ;;  %v1143_v36 = vsel %vm1141_vm10, %v1140_v35, %v1782_v32  ;;  %v1710_v59 = vld [vmem:[%s2070_s13 + $0x18] sm:$0xff]  ;;  %v1709_v33 = vld [vmem:[%s2070_s13 + $0x10] sm:$0xff]  ;;  %v1708_v35 = vld [vmem:[%s2070_s13 + $0x8] sm:$0xff] }
 0x476   : > { %v1144_v40 = vpack.c.bf16 %v1143_v36, %v1142_v22  ;;  %1320 = vmatpush.bf16.msra.mxu3 %v1710_v59  ;;  %v1707_v22 = vld [vmem:[%s2070_s13] sm:$0xff] }
 0x478   : > { %1662 = vmatmul.msk.bf16.vlgmr.msra.gmra.mxu1 %vm496_vm1, %v1144_v40  ;;  %v1784_v40 = vld [vmem:[%s461_s22] ss:$0 sm:$0xff] }
 0x47a   : > { %1321 = vmatpush.bf16.msra.mxu3 %v1709_v33 }
 0x47e   : > { %1322 = vmatpush.bf16.msra.mxu3 %v1708_v35 }
 0x482   : > { %1323 = vmatpush.bf16.msra.mxu3 %v1707_v22 }
 0x4f5   : > { %v1174_v11 = vpop.f32.mrf.mxu1 }
 0x4f6   : > { %v1175_v44 = vadd.f32 %v1174_v11, %v1149_v43 }
 0x4f8   : > { %v1179_v45 = vadd.f32 %v1175_v44, %v2095_v4  ;;  %v2273_v4 = vsel %vm1192_vm2, %v1818_v52, %v1191_v57 }
 0x4fa   : > { %v1181_v46 = vsel %vm496_vm1, %v1179_v45, 0.0 }
 0x4fb   : > { %1182 = vadd.xlane.f32.xlu2 %v1181_v46 }
 0x4fd   : > { %v1176_v47 = vpop.f32.mrf.mxu1 }
 0x4fe   : > { %v1177_v48 = vadd.f32 %v1176_v47, %v1149_v43 }
 0x500   : > { %v1180_v50 = vadd.f32 %v1177_v48, %v2097_v5  ;;  %v1287_v48 = vperm.slane %v2266_v42, 3 }
 0x502   : > { %v1184_v51 = vsel %vm496_vm1, %v1180_v50, 0.0 }
 0x503   : > { %1185 = vadd.xlane.f32.xlu1 %v1184_v51 }
 0x56e   : > { %v1183_v39 = vpop.xlane.xlu2 %1182 }
 0x56f   : > { %v1194_v58 = vmul.f32 %v2273_v4, %v1183_v39 }
 0x571   : > { %v1196_v60 = vsub.f32 %v1179_v45, %v1194_v58 }
 0x573   : > { %v1198_v5 = vmul.f32 %v1196_v60, %v1196_v60 }
 0x575   : > { %v1200_v61 = vsel %vm496_vm1, %v1198_v5, 0.0 }
 0x576   : > { %v1186_v62 = vpop.xlane.xlu1 %1185  ;;  %1201 = vadd.xlane.f32.xlu0 %v1200_v61 }
 0x577   : > { %v1195_v1 = vmul.f32 %v2273_v4, %v1186_v62 }
 0x579   : > { %v1197_v63 = vsub.f32 %v1180_v50, %v1195_v1 }
 0x57b   : > { %v1199_v0 = vmul.f32 %v1197_v63, %v1197_v63 }
 0x57d   : > { %v1203_v31 = vsel %vm496_vm1, %v1199_v0, 0.0 }
 0x57e   : > { %1204 = vadd.xlane.f32.xlu2 %v1203_v31 }
 0x5e9   : > { %v1202_v30 = vpop.xlane.xlu0 %1201 }
 0x5ea   : > { %v1206_v2 = vmul.f32 %v1202_v30, %v2273_v4 }
 0x5ec   : > { %v1208_v21 = vadd.f32 1e-05, %v1206_v2 }
 0x5ee   : > { %1819 = vrsqrt.f32 %v1208_v21  ;;  %vm1216_vm12 = vweird.f32 %v1208_v21 }
 0x5f1   : > { %v1205_v37 = vpop.xlane.xlu2 %1204 }
 0x5f2   : > { %v1207_v3 = vmul.f32 %v1205_v37, %v2273_v4 }
 0x5f4   : > { %v1820_v7 = vpop.eup %1819  ;;  %v1209_v41 = vadd.f32 1e-05, %v1207_v3 }
 0x5f5   : > { %v1211_v8 = vmul.f32 %v1820_v7, %v1208_v21  ;;  %vm1217_vm11 = vweird.f32 %v1820_v7 }
 0x5f6   : > { %1821 = vrsqrt.f32 %v1209_v41  ;;  %vm1218_vm13 = vmor %vm1216_vm12, %vm1217_vm11  ;;  %vm1226_vm15 = vweird.f32 %v1209_v41 }
 0x5f7   : > { %v1212_v12 = vmul.f32 %v1820_v7, %v1211_v8 }
 0x5f9   : > { %v1213_v49 = vmul.f32 0.5, %v1212_v12 }
 0x5fb   : > { %v1214_v9 = vsub.f32 1.5, %v1213_v49 }
 0x5fc   : > { %v1822_v10 = vpop.eup %1821 }
 0x5fd   : > { %v1215_v13 = vmul.f32 %v1820_v7, %v1214_v9  ;;  %v1221_v14 = vmul.f32 %v1822_v10, %v1209_v41  ;;  %vm1227_vm14 = vweird.f32 %v1822_v10 }
 0x5fe   : > { %vm1228_vm0 = vmor %vm1226_vm15, %vm1227_vm14 }
 0x5ff   : > { %v1222_v15 = vmul.f32 %v1822_v10, %v1221_v14  ;;  %v1219_v16 = vsel %vm1218_vm13, %v1820_v7, %v1215_v13  ;;  %v1376_v13 = vperm.slane %v2266_v42, 4 }
 0x600   : > { %v1230_v20 = vmul.f32 %v1219_v16, %v1196_v60  ;;  %v1379_v16 = vperm.slane %v2266_v42, 5 }
 0x601   : > { %v1223_v17 = vmul.f32 0.5, %v1222_v15 }
 0x602   : > { %v1233_v25 = vmul.f32 %v1232_v19, %v1230_v20 }
 0x603   : > { %v1224_v18 = vsub.f32 1.5, %v1223_v17 }
 0x604   : > { %v1236_v28 = vadd.f32 %v1235_v24, %v1233_v25 }
 0x605   : > { %v1225_v23 = vmul.f32 %v1822_v10, %v1224_v18 }
 0x607   : > { %v1229_v54 = vsel %vm1228_vm0, %v1822_v10, %v1225_v23 }
 0x608   : > { %v1231_v26 = vmul.f32 %v1229_v54, %v1197_v63 }
 0x60a   : > { %v1234_v27 = vmul.f32 %v1232_v19, %v1231_v26 }
 0x60c   : > { %v1237_v29 = vadd.f32 %v1235_v24, %v1234_v27 }
 0x60e   : > { %v1238_v32 = vpack.c.bf16 %v1237_v29, %v1236_v28 }
 0x610   : > { %1671 = vmatmul.msk.bf16.vlgmr.msra.gmra.mxu2 %vm496_vm1, %v1238_v32 }
 0x693   : > { %v1271_v36 = vpop.f32.mrf.mxu2 }
 0x694   : > { %v1272_v43 = vadd.f32 %v1784_v40, %v1271_v36 }
 0x696   : > { %v1276_v45 = vmax.f32 %v1272_v43, 0.0 }
 0x69b   : > { %v1273_v11 = vpop.f32.mrf.mxu2 }
 0x69c   : > { %v1274_v44 = vadd.f32 %v1784_v40, %v1273_v11 }
 0x69e   : > { %v1277_v46 = vmax.f32 %v1274_v44, 0.0 }
 0x6a0   : > { %v1278_v47 = vpack.c.bf16 %v1277_v46, %v1276_v45 }
 0x6a2   : > { %1688 = vmatmul.msk.bf16.vlgmr.msra.gmra.mxu3 %vm1312_vm4, %v1278_v47 }
 0x725   : > { %v1325_v50 = vpop.f32.mrf.mxu3 }
 0x726   : > { %v1326_v51 = vadd.f32 %v1325_v50, %v1287_v48 }
 0x728   : > { %v1330_v34 = vadd.f32 %v1326_v51, %v1236_v28 }
 0x72a   : > { %v1332_v52 = vsel %vm496_vm1, %v1330_v34, 0.0 }
 0x72b   : > { %1333 = vadd.xlane.f32.xlu1 %v1332_v52 }
 0x72d   : > { %v1327_v53 = vpop.f32.mrf.mxu3 }
 0x72e   : > { %v1328_v55 = vadd.f32 %v1327_v53, %v1287_v48 }
 0x730   : > { %v1331_v56 = vadd.f32 %v1328_v55, %v1237_v29 }
 0x732   : > { %v1335_v57 = vsel %vm496_vm1, %v1331_v56, 0.0 }
 0x733   : > { %1336 = vadd.xlane.f32.xlu2 %v1335_v57 }
 0x79e   : > { %v1334_v39 = vpop.xlane.xlu1 %1333 }
 0x79f   : > { %v1338_v58 = vmul.f32 %v1334_v39, %v2273_v4 }
 0x7a1   : > { %v1340_v60 = vsub.f32 %v1330_v34, %v1338_v58 }
 0x7a3   : > { %v1342_v5 = vmul.f32 %v1340_v60, %v1340_v60 }
 0x7a5   : > { %v1344_v61 = vsel %vm496_vm1, %v1342_v5, 0.0 }
 0x7a6   : > { %v1337_v62 = vpop.xlane.xlu2 %1336  ;;  %1345 = vadd.xlane.f32.xlu1 %v1344_v61 }
 0x7a7   : > { %v1339_v1 = vmul.f32 %v1337_v62, %v2273_v4 }
 0x7a9   : > { %v1341_v63 = vsub.f32 %v1331_v56, %v1339_v1 }
 0x7ab   : > { %v1343_v0 = vmul.f32 %v1341_v63, %v1341_v63 }
 0x7ad   : > { %v1347_v31 = vsel %vm496_vm1, %v1343_v0, 0.0 }
 0x7ae   : > { %1348 = vadd.xlane.f32.xlu2 %v1347_v31 }
 0x819   : > { %v1346_v38 = vpop.xlane.xlu1 %1345 }
 0x81a   : > { %v1350_v30 = vmul.f32 %v1346_v38, %v2273_v4 }
 0x81c   : > { %v1352_v2 = vadd.f32 1e-05, %v1350_v30 }
 0x81e   : > { %1823 = vrsqrt.f32 %v1352_v2  ;;  %vm1360_vm5 = vweird.f32 %v1352_v2 }
 0x821   : > { %v1349_v21 = vpop.xlane.xlu2 %1348 }
 0x822   : > { %v1351_v6 = vmul.f32 %v1349_v21, %v2273_v4 }
 0x824   : > { %v1824_v37 = vpop.eup %1823  ;;  %v1353_v3 = vadd.f32 1e-05, %v1351_v6 }
 0x825   : > { %v1355_v7 = vmul.f32 %v1824_v37, %v1352_v2  ;;  %vm1361_vm3 = vweird.f32 %v1824_v37 }
 0x826   : > { %1825 = vrsqrt.f32 %v1353_v3  ;;  %vm1362_vm6 = vmor %vm1360_vm5, %vm1361_vm3  ;;  %vm1370_vm8 = vweird.f32 %v1353_v3 }
 0x827   : > { %v1356_v41 = vmul.f32 %v1824_v37, %v1355_v7 }
 0x829   : > { %v1357_v8 = vmul.f32 0.5, %v1356_v41 }
 0x82b   : > { %v1358_v12 = vsub.f32 1.5, %v1357_v8 }
 0x82c   : > { %v1826_v49 = vpop.eup %1825 }
 0x82d   : > { %v1359_v9 = vmul.f32 %v1824_v37, %v1358_v12  ;;  %v1365_v10 = vmul.f32 %v1826_v49, %v1353_v3  ;;  %vm1371_vm7 = vweird.f32 %v1826_v49 }
 0x82e   : > { %vm1372_vm9 = vmor %vm1370_vm8, %vm1371_vm7 }
 0x82f   : > { %v1363_v14 = vsel %vm1362_vm6, %v1824_v37, %v1359_v9  ;;  %v1366_v15 = vmul.f32 %v1826_v49, %v1365_v10 }
 0x830   : > { %v1374_v17 = vmul.f32 %v1363_v14, %v1340_v60 }
 0x831   : > { %v1367_v18 = vmul.f32 0.5, %v1366_v15 }
 0x832   : > { %v1377_v19 = vmul.f32 %v1376_v13, %v1374_v17 }
 0x833   : > { %v1368_v20 = vsub.f32 1.5, %v1367_v18 }
 0x834   : > { %v1380_v23 = vadd.f32 %v1379_v16, %v1377_v19 }
 0x835   : > { %v1369_v54 = vmul.f32 %v1826_v49, %v1368_v20 }
 0x836   : > { %1382 = vst.msk [vmem:[#allocation2] sm:$0xff] %vm496_vm1, %v1380_v23 }
 0x837   : > { %v1373_v24 = vsel %vm1372_vm9, %v1826_v49, %v1369_v54 }
 0x838   : > { %v1375_v25 = vmul.f32 %v1373_v24, %v1341_v63 }
 0x83a   : > { %v1378_v26 = vmul.f32 %v1376_v13, %v1375_v25  ;;  %1387 = sbr.rel (%p1689_p12) target bundleno = 2388 (0x954), region = 64 }
 0x83c   : > { %v1381_v27 = vadd.f32 %v1379_v16, %v1378_v26 }
 0x83e   : > { %1383 = vst.msk [vmem:[#allocation2 + $0x8] sm:$0xff] %vm496_vm1, %v1381_v27 }
 0x83f   : > { %v1390_v42 = vsel %vm496_vm1, %v1380_v23, 0.0  ;;  %v1393_v28 = vsel %vm496_vm1, %v1381_v27, 0.0  ;;  %v1827_v58 = vld [vmem:[%s2378_s8] ss:$0 sm:$0xff]  ;;  %v1828_v61 = vld [vmem:[%s2378_s8 + $0x1] ss:$0 sm:$0xff] }
 0x840   : > { %1391 = vadd.xlane.f32.xlu0 %v1390_v42 }
 0x848   : > { %1394 = vadd.xlane.f32.xlu0 %v1393_v28 }
 0x8b3   : > { %v1392_v29 = vpop.xlane.xlu0 %1391 }
 0x8b4   : > { %v1396_v32 = vmul.f32 %v1392_v29, %v2273_v4 }
 0x8b6   : > { %v1398_v59 = vsub.f32 %v1380_v23, %v1396_v32 }
 0x8b8   : > { %v1400_v33 = vmul.f32 %v1398_v59, %v1398_v59 }
 0x8ba   : > { %v1402_v35 = vsel %vm496_vm1, %v1400_v33, 0.0 }
 0x8bb   : > { %1403 = vadd.xlane.f32.xlu1 %v1402_v35  ;;  %v1395_v22 = vpop.xlane.xlu0 %1394 }
 0x8bc   : > { %v1397_v36 = vmul.f32 %v1395_v22, %v2273_v4 }
 0x8be   : > { %v1399_v40 = vsub.f32 %v1381_v27, %v1397_v36 }
 0x8c0   : > { %v1401_v43 = vmul.f32 %v1399_v40, %v1399_v40 }
 0x8c2   : > { %v1405_v11 = vsel %vm496_vm1, %v1401_v43, 0.0 }
 0x8c3   : > { %1406 = vadd.xlane.f32.xlu1 %v1405_v11 }
 0x92e   : > { %v1404_v44 = vpop.xlane.xlu1 %1403 }
 0x92f   : > { %v1408_v45 = vmul.f32 %v1404_v44, %v2273_v4 }
 0x931   : > { %v1410_v46 = vadd.f32 1e-05, %v1408_v45 }
 0x933   : > { %1829 = vrsqrt.f32 %v1410_v46  ;;  %vm1418_vm2 = vweird.f32 %v1410_v46 }
 0x936   : > { %v1407_v47 = vpop.xlane.xlu1 %1406 }
 0x937   : > { %v1409_v48 = vmul.f32 %v1407_v47, %v2273_v4 }
 0x939   : > { %v1830_v50 = vpop.eup %1829  ;;  %v1411_v51 = vadd.f32 1e-05, %v1409_v48 }
 0x93a   : > { %v1413_v34 = vmul.f32 %v1830_v50, %v1410_v46  ;;  %vm1419_vm10 = vweird.f32 %v1830_v50 }
 0x93b   : > { %1831 = vrsqrt.f32 %v1411_v51  ;;  %vm1420_vm11 = vmor %vm1418_vm2, %vm1419_vm10  ;;  %vm1428_vm13 = vweird.f32 %v1411_v51 }
 0x93c   : > { %v1414_v52 = vmul.f32 %v1830_v50, %v1413_v34 }
 0x93e   : > { %v1415_v53 = vmul.f32 0.5, %v1414_v52 }
 0x940   : > { %v1416_v55 = vsub.f32 1.5, %v1415_v53 }
 0x941   : > { %v1832_v56 = vpop.eup %1831 }
 0x942   : > { %v1417_v57 = vmul.f32 %v1830_v50, %v1416_v55  ;;  %v1423_v39 = vmul.f32 %v1832_v56, %v1411_v51  ;;  %vm1429_vm12 = vweird.f32 %v1832_v56 }
 0x943   : > { %vm1430_vm14 = vmor %vm1428_vm13, %vm1429_vm12 }
 0x944   : > { %v1421_v60 = vsel %vm1420_vm11, %v1830_v50, %v1417_v57  ;;  %v1424_v5 = vmul.f32 %v1832_v56, %v1423_v39 }
 0x945   : > { %v1432_v4 = vmul.f32 %v1421_v60, %v1398_v59 }
 0x946   : > { %v1425_v62 = vmul.f32 0.5, %v1424_v5 }
 0x947   : > { %v1435_v1 = vmul.f32 %v1827_v58, %v1432_v4 }
 0x948   : > { %v1426_v63 = vsub.f32 1.5, %v1425_v62 }
 0x949   : > { %v1438_v0 = vadd.f32 %v1828_v61, %v1435_v1 }
 0x94a   : > { %v1427_v31 = vmul.f32 %v1832_v56, %v1426_v63 }
 0x94b   : > { %1440 = vst.msk [vmem:[#allocation3] sm:$0xff] %vm496_vm1, %v1438_v0 }
 0x94c   : > { %v1431_v38 = vsel %vm1430_vm14, %v1832_v56, %v1427_v31 }
 0x94d   : > { %v1433_v30 = vmul.f32 %v1431_v38, %v1399_v40 }
 0x94f   : > { %v1436_v2 = vmul.f32 %v1827_v58, %v1433_v30 }
 0x951   : > { %v1439_v21 = vadd.f32 %v1828_v61, %v1436_v2 }
 0x953   : > { %1441 = vst.msk [vmem:[#allocation3 + $0x8] sm:$0xff] %vm496_vm1, %v1439_v21 }
 0x954 PF: > { %s1454_s19 = sshll.u32 %s2379_s9, 4  ;;  %s1938_s24 = smov [#allocation3]   ;;  %s1455_s19 = int_to_ptr.hbm [resolvable:$true] %s1454_s19 }
 0x955   : > { %s1452_s10 = sshll.u32 %s1938_s24, 4  ;;  %s1939_s1 = smov 128   ;;  %s1453_s10 = int_to_ptr.vmem [resolvable:$true] %s1452_s10 }
 0x956   : > { %1713 = dma.vmem_to_hbm [thread:$0]  (%p288_p2), %s1453_s10, 256, %s1455_s19, [#allocation4], %s1939_s1, %s1939_s1, %s1934_s29  }
 0x957   : > { %s1711_s2 = sshll.u32 %s2016_s17, 6  ;;  %s2406_s28 = sld [smem:[#allocation18_spill]] }
 0x958   : > { %s1469_s30 = sshll.u32 %s2086_s25, 4  ;;  %s2407_s21 = sand.u32 1, %s1919_s14   ;;  %s1470_s30 = int_to_ptr.vmem [resolvable:$true] %s1469_s30 }
 0x959   : > { %s1443_s13 = scalar_lea.sflag [#allocation6], %s2407_s21 }
 0x95d   : > { %s1468_s12 = scalar_lea.hbm %s2406_s28, %s1711_s2  ;;  %s1881_s22 = scalar_lea.hbm %s2406_s28, 128 }
 0x95e   : > { %s1471_s15 = sshll.u32 %s1468_s12, 4  ;;  %s1472_s15 = int_to_ptr.hbm [resolvable:$true] %s1471_s15 }
 0x95f   : > { %s1875_s27 = sshra.s32 %s1472_s15, 4  ;;  %s1876_s27 = int_to_ptr.hbm [resolvable:$true] %s1875_s27 }
 0x960   : > { %s1877_s11 = scalar_lea.hbm %s1876_s27, 64  ;;  %p1882_p3 = scmp.lt.s32.totalorder %s1876_s27, %s2406_s28 }
 0x961   : > { %p1878_p13 = scmp.ne.s32.totalorder %s1876_s27, %s1877_s11  ;;  %p1883_p4 = scmp.lt.s32.totalorder %s1881_s22, %s1877_s11 }
 0x963   : > { %p1879_p0 = pnand %p1878_p13, %p2035_p5  ;;  %p1884_p7 = por %p1883_p4, %p1882_p3 }
 0x965   : > { %p1880_p1 = pneg %p1879_p0 }
 0x967   : > { %p1885_p8 = pnand %p1884_p7, %p1880_p1 }
 0x969   : > { %1888 = shalt.err (!%p1885_p8)
}
 0x96a   : > { %1714 = dma.vmem_to_hbm [thread:$0]  (%p2035_p5), %s1470_s30, 1024, %s1472_s15, %s1443_s13, %s1939_s1, %s1939_s1, %s1934_s29  }
 0x96b   : > { %1906 = dma.done.wait (%p288_p2), [#allocation4], 256  }
 0x96c   : > { %1908 = vsyncadd (%p288_p2), [#allocation4], 4294967040 }
 0x96d PF: > { %s2408_s25 = sld [smem:[#allocation11_spill]] }
 0x96e   : > { %s2409_s10 = sld [smem:[#allocation9_spill]] }
 0x973   : > { %p1724_p9 = scmp.ge.s32.totalorder %s2408_s25, 2 }
 0x974   : > { %s1491_s23 = sand.u32 1, %s2409_s10  }
 0x975   : > { %p1719_p10 = pnand %p1724_p9, %p2039_p6  ;;  %s1492_s26 = scalar_lea.sflag [#allocation6], %s1491_s23 }
 0x977   : > { %p1720_p11 = pneg %p1719_p10 }
 0x979   : > { %1910 = dma.done.wait (%p1720_p11), %s1492_s26, 1024  }
 0x97a   : > { %1912 = vsyncadd (%p1720_p11), %s1492_s26, 4294966272  ;;  %s2411_s16 = sld [smem:[#allocation12_spill]]  ;;  %s2414_s13 = smov %s1919_s14 }
 0x97b   : > { %s2412_s29 = sld [smem:[#allocation10_spill]] }
 0x97c   : > { %s2413_s15 = sld [smem:[#allocation13_spill]] }
 0x980   : > { %p22_p5 = scmp.ge.s32.totalorder %s2411_s16, 4  }
 0x981   : > { %s2415_s14 = smov %s2412_s29 }
 0x982   :  { %24 = sbr.rel (!%p22_p5) target bundleno = 8 (0x8), region = 126 }
 0x987   :  { %1498 = vsyncpa [#allocation4], 1 }
 0x988   :  { %1500 = vsyncpa [#allocation4 + $0x1], 1 }
 0x989   :  { %1501 = vsyncpa [#allocation6], 1 }
 0x98a   :  { %1503 = vsyncpa [#allocation6 + $0x1], 1 }

</bundles_post_ra>
